<compile_context>
chip_gen: v6e
topology: v6e:2x2x1
jax: 0.10.0
libtpu: 0.0.40
codegen_flags: <defaults>
</compile_context>

<pallas_src>
import functools

import jax
import jax.numpy as jnp
from jax import lax
from jax.experimental import pallas as pl
from jax.experimental.pallas import tpu as pltpu


# --------------------------------- the kernel --------------------------------

def _gnn_kernel(
    x_ref, a_ref, b_ref, bt_ref,
    pre_w_ref, conv_w1_ref, conv_w2_ref, mem_ref,
    att_w1_ref, att_w2_ref, cls_w_ref,
    bias_h_ref, att_b1_ref, att_b2_ref, cls_b_ref,
    out_ref,
    h_sc, agg_sc, g_sc,
    *, nhid, tk,
):
    H = nhid
    f32, bf16 = jnp.float32, jnp.bfloat16
    l = pl.program_id(0)            # layer index (sequential)
    k = pl.program_id(1)            # A column-slab index (reduction)
    nk = pl.num_programs(1)

    # -- prologue: pre_conv on the very first grid step -------------------------
    @pl.when(jnp.logical_and(l == 0, k == 0))
    def _():
        h0 = jnp.dot(x_ref[...], pre_w_ref[...], preferred_element_type=f32)
        h_sc[...] = h0 + bias_h_ref[0]                       # [Np, H]

    @pl.when(k == 0)
    def _():
        agg_sc[...] = jnp.zeros_like(agg_sc)

    # -- streamed neighbor aggregation: agg += A[:, k-slab] @ h[k-slab, :] -------
    start = pl.multiple_of(k * tk, tk)
    h_slab = h_sc[pl.ds(start, tk), :].astype(bf16)
    agg_sc[...] += jnp.dot(a_ref[...], h_slab, preferred_element_type=f32)

    # -- finish the layer once the reduction over A slabs is complete -----------
    @pl.when(k == nk - 1)
    def _():
        h_in = h_sc[...]
        agg = agg_sc[...]

        # StructConv: MLP(cat([h, agg])) with a single stacked [2H, H] weight.
        # cat([h, agg]) @ W == h @ W[:H] + agg @ W[H:]  (keeps the single weight
        # DMA while avoiding an in-kernel lane concatenation/relayout).
        w1 = conv_w1_ref[l]                                  # [2H, H] bf16
        z = (jnp.dot(h_in.astype(bf16), w1[:H, :], preferred_element_type=f32)
             + jnp.dot(agg.astype(bf16), w1[H:, :], preferred_element_type=f32)
             + bias_h_ref[2 * l + 1])
        z = jnp.maximum(z, 0.0)
        h_act = jnp.dot(z.astype(bf16), conv_w2_ref[l], preferred_element_type=f32)
        h_act = jnp.maximum(h_act + bias_h_ref[2 * l + 2], 0.0)   # F.relu after conv

        # MemModule ('dp', use_key=False): read-out replaces the features.
        mem = mem_ref[l]                                     # [k_mem, H] bf16
        scores = lax.dot_general(h_act.astype(bf16), mem,
                                 (((1,), (1,)), ((), ())),
                                 preferred_element_type=f32)      # [Np, k_mem]
        scores = scores - jnp.max(scores, axis=-1, keepdims=True)
        es = jnp.exp(scores)
        sim = es * pl.reciprocal(jnp.sum(es, axis=-1, keepdims=True), approx=True)
        h_new = jnp.dot(sim.astype(bf16), mem, preferred_element_type=f32)  # [Np, H]
        h_sc[...] = h_new            # becomes the next layer's input features

        # GlobalAttention pooling: fused [up | gate] MLPs (single dot each),
        # numerically-robust per-graph segment softmax.
        bt = bt_ref[...]                                     # [Np, G] f32 one-hot
        hid = jnp.dot(h_new.astype(bf16), att_w1_ref[l],
                      preferred_element_type=f32) + att_b1_ref[l]
        hid = jnp.maximum(hid, 0.0)                          # [Np, 2H] = [up_hid|gate_hid]
        gu = jnp.dot(hid.astype(bf16), att_w2_ref[l],
                     preferred_element_type=f32) + att_b2_ref[l]  # [Np, 2H+1]
        up = gu[:, :2 * H]                                   # [Np, 2H]
        gate = gu[:, 2 * H:2 * H + 1]                        # [Np, 1]

        masked = jnp.where(bt > 0.0, gate, -1e30)            # per-graph max
        seg_max = jnp.max(masked, axis=0, keepdims=True)     # [1, G]
        node_max = jnp.sum(bt * seg_max, axis=1, keepdims=True)  # [Np, 1]
        # clamp <=0: no-op for real nodes, keeps padded nodes from overflowing exp
        e = jnp.exp(jnp.minimum(gate - node_max, 0.0))       # [Np, 1]
        denom = jnp.sum(bt * e, axis=0, keepdims=True)       # [1, G]
        inv = pl.reciprocal(denom, approx=True)              # [1, G]  (EUP)
        alpha = e * jnp.sum(bt * inv, axis=1, keepdims=True)  # [Np, 1]
        g_out = jnp.dot(b_ref[...], (alpha * up).astype(bf16),
                        preferred_element_type=f32)          # [G, 2H]
        g_sc[l] = g_out

        # final classifier (cat([att_1(h1), att_2(h2)]) @ W) + log-softmax
        @pl.when(l == 1)
        def _():
            g1 = g_sc[0]
            cls_w = cls_w_ref[...]                           # [4H, C] bf16
            logits = (jnp.dot(g1.astype(bf16), cls_w[:2 * H, :],
                              preferred_element_type=f32)
                      + jnp.dot(g_out.astype(bf16), cls_w[2 * H:, :],
                                preferred_element_type=f32)
                      + cls_b_ref[...])                      # [G, C]
            logits = logits - jnp.max(logits, axis=-1, keepdims=True)
            out_ref[...] = logits - jnp.log(jnp.sum(jnp.exp(logits),
                                                    axis=-1, keepdims=True))


# --------------------------------- parameters --------------------------------

def init_params(key, nfeat, nhid, nclass, n_mem=(8, 8)):
    H = nhid
    shapes = {
        "pre_w": (nfeat, H), "pre_b": (H,),
        "conv0_w1": (2 * H, H), "conv0_b1": (H,), "conv0_w2": (H, H), "conv0_b2": (H,),
        "mem0": (n_mem[0], H),
        "conv1_w1": (2 * H, H), "conv1_b1": (H,), "conv1_w2": (H, H), "conv1_b2": (H,),
        "mem1": (n_mem[1], H),
        "att1_gw1": (H, H), "att1_gb1": (H,), "att1_gw2": (H, 1), "att1_gb2": (1,),
        "att1_uw1": (H, H), "att1_ub1": (H,), "att1_uw2": (H, 2 * H), "att1_ub2": (2 * H,),
        "att2_gw1": (H, H), "att2_gb1": (H,), "att2_gw2": (H, 1), "att2_gb2": (1,),
        "att2_uw1": (H, H), "att2_ub1": (H,), "att2_uw2": (H, 2 * H), "att2_ub2": (2 * H,),
        "lin_w": (4 * H, nclass), "lin_b": (nclass,),
    }
    keys = jax.random.split(key, len(shapes))
    return {name: 0.1 * jax.random.normal(k, shp, jnp.float32)
            for k, (name, shp) in zip(keys, shapes.items())}


def _pack_params(p, H):
    """Pack the ~31 logical tensors into a few stacked slabs (fewer DMAs) and
    pre-fuse the GlobalAttention gate/up MLPs so each becomes a single dot."""
    f32, bf16 = jnp.float32, jnp.bfloat16
    assert p["mem0"].shape == p["mem1"].shape, "n_mem must match across layers"

    conv_w1 = jnp.stack([p["conv0_w1"], p["conv1_w1"]]).astype(bf16)     # [2,2H,H]
    conv_w2 = jnp.stack([p["conv0_w2"], p["conv1_w2"]]).astype(bf16)     # [2,H,H]
    mem = jnp.stack([p["mem0"], p["mem1"]]).astype(bf16)                 # [2,k,H]
    bias_h = jnp.stack([p["pre_b"], p["conv0_b1"], p["conv0_b2"],
                        p["conv1_b1"], p["conv1_b2"]])[:, None, :].astype(f32)  # [5,1,H]

    def fuse_att(pre):
        # fused first layer: hid = relu(h @ [uw1 | gw1] + [ub1 | gb1])
        w1 = jnp.concatenate([p[f"{pre}_uw1"], p[f"{pre}_gw1"]], axis=1)  # [H,2H]
        b1 = jnp.concatenate([p[f"{pre}_ub1"], p[f"{pre}_gb1"]], axis=0)  # [2H]
        # fused (block-diagonal) second layer: [up | gate] = hid @ W2f + [ub2|gb2]
        w2 = jnp.zeros((2 * H, 2 * H + 1), f32)
        w2 = w2.at[:H, :2 * H].set(p[f"{pre}_uw2"])
        w2 = w2.at[H:, 2 * H:].set(p[f"{pre}_gw2"])
        b2 = jnp.concatenate([p[f"{pre}_ub2"], p[f"{pre}_gb2"]], axis=0)  # [2H+1]
        return w1, b1, w2, b2

    a1, a2 = fuse_att("att1"), fuse_att("att2")
    att_w1 = jnp.stack([a1[0], a2[0]]).astype(bf16)                      # [2,H,2H]
    att_b1 = jnp.stack([a1[1], a2[1]])[:, None, :].astype(f32)           # [2,1,2H]
    att_w2 = jnp.stack([a1[2], a2[2]]).astype(bf16)                      # [2,2H,2H+1]
    att_b2 = jnp.stack([a1[3], a2[3]])[:, None, :].astype(f32)           # [2,1,2H+1]

    return dict(pre_w=p["pre_w"].astype(bf16), conv_w1=conv_w1, conv_w2=conv_w2,
                mem=mem, att_w1=att_w1, att_w2=att_w2,
                cls_w=p["lin_w"].astype(bf16), bias_h=bias_h,
                att_b1=att_b1, att_b2=att_b2,
                cls_b=p["lin_b"][None, :].astype(f32))


# --------------------------------- wrapper ------------------------------------

@functools.partial(jax.jit, static_argnames=("num_graphs",))
def struct_att_graph_gnn(x, edge_index, edge_weight, batch, params, num_graphs):
    N, F = x.shape
    H = params["pre_w"].shape[1]
    C = params["lin_b"].shape[-1]
    G = num_graphs
    Np = ((N + 127) // 128) * 128          # pad nodes to a lane-friendly multiple of 128

    # dense padded adjacency (exact f32 accumulation of duplicate edges, stored bf16)
    src, dst = edge_index[0], edge_index[1]
    A = jnp.zeros((Np, Np), jnp.float32).at[dst, src].add(edge_weight.astype(jnp.float32))
    A = A.astype(jnp.bfloat16)
    batch_p = jnp.full((Np,), G, jnp.int32).at[:N].set(batch.astype(jnp.int32))
    onehot = batch_p[None, :] == jnp.arange(G, dtype=jnp.int32)[:, None]    # [G, Np]
    B = onehot.astype(jnp.bfloat16)
    BT = onehot.T.astype(jnp.float32)
    xp = jnp.zeros((Np, F), jnp.bfloat16).at[:N, :].set(x.astype(jnp.bfloat16))

    packed = _pack_params(params, H)

    # K-tile for streaming A in [Np, tk] column slabs
    if Np <= 512:
        tk = Np
    elif Np % 512 == 0:
        tk = 512
    elif Np % 256 == 0:
        tk = 256
    else:
        tk = 128
    kb = Np // tk

    inputs = [xp, A, B, BT,
              packed["pre_w"], packed["conv_w1"], packed["conv_w2"], packed["mem"],
              packed["att_w1"], packed["att_w2"], packed["cls_w"],
              packed["bias_h"], packed["att_b1"], packed["att_b2"], packed["cls_b"]]

    def full_spec(arr):
        nd = arr.ndim
        return pl.BlockSpec(arr.shape, lambda l, k, _nd=nd: (0,) * _nd)

    in_specs = ([full_spec(inputs[0]),
                 pl.BlockSpec((Np, tk), lambda l, k: (0, k))]   # stream A column slabs
                + [full_spec(a) for a in inputs[2:]])

    # explicit VMEM budget: 2x double-buffered A slab + resident inputs + scratch
    # + live activation set, clamped to v7x's 64 MiB physical VMEM.
    other_bytes = sum(int(a.size) * a.dtype.itemsize
                      for i, a in enumerate(inputs) if i != 1)
    a_bytes = Np * tk * 2
    scratch_bytes = (2 * Np * H + 2 * G * 2 * H) * 4
    live_bytes = Np * (6 * H + 2) * 4
    vmem_limit = int(min(max(2 * a_bytes + 2 * other_bytes + scratch_bytes
                             + 3 * live_bytes + (2 << 20), 8 << 20), 64 << 20))

    kernel = functools.partial(_gnn_kernel, nhid=H, tk=tk)
    return pl.pallas_call(
        kernel,
        out_shape=jax.ShapeDtypeStruct((G, C), jnp.float32),
        grid=(2, kb),                       # (layer, A-column slab)
        in_specs=in_specs,
        out_specs=pl.BlockSpec((G, C), lambda l, k: (0, 0)),
        scratch_shapes=[pltpu.VMEM((Np, H), jnp.float32),       # current features
                        pltpu.VMEM((Np, H), jnp.float32),       # aggregation acc
                        pltpu.VMEM((2, G, 2 * H), jnp.float32)],  # pooled per layer
        compiler_params=pltpu.CompilerParams(
            # layer axis and reduction axis are both sequential; a "parallel"
            # node-row axis (for v7x's 2nd TC) needs the row-tiled restructure (TODO above).
            dimension_semantics=("arbitrary", "arbitrary"),
            vmem_limit_bytes=vmem_limit),
    )(*inputs)


# --------------------------- pure-JAX f32 reference ---------------------------

def _reference_forward(x, edge_index, edge_weight, batch, p, num_graphs):
    N = x.shape[0]
    src, dst = edge_index[0], edge_index[1]
    A = jnp.zeros((N, N), jnp.float32).at[dst, src].add(edge_weight.astype(jnp.float32))

    def mlp(h, w1, b1, w2, b2):
        return jnp.maximum(h @ w1 + b1, 0.0) @ w2 + b2

    h = x @ p["pre_w"] + p["pre_b"]
    feats = []
    for l in range(2):
        agg = A @ h
        cat = jnp.concatenate([h, agg], axis=-1)
        h = jnp.maximum(mlp(cat, p[f"conv{l}_w1"], p[f"conv{l}_b1"],
                            p[f"conv{l}_w2"], p[f"conv{l}_b2"]), 0.0)
        sim = jax.nn.softmax(h @ p[f"mem{l}"].T, axis=-1)
        h = sim @ p[f"mem{l}"]
        feats.append(h)

    def pool(h, pre):
        gate = mlp(h, p[f"{pre}_gw1"], p[f"{pre}_gb1"],
                   p[f"{pre}_gw2"], p[f"{pre}_gb2"])[:, 0]
        up = mlp(h, p[f"{pre}_uw1"], p[f"{pre}_ub1"],
                 p[f"{pre}_uw2"], p[f"{pre}_ub2"])
        seg_max = jax.ops.segment_max(gate, batch, num_segments=num_graphs)
        e = jnp.exp(gate - seg_max[batch])
        denom = jax.ops.segment_sum(e, batch, num_segments=num_graphs)
        alpha = e / denom[batch]
        return jax.ops.segment_sum(alpha[:, None] * up, batch, num_segments=num_graphs)

    g = jnp.concatenate([pool(feats[0], "att1"), pool(feats[1], "att2")], axis=-1)
    logits = g @ p["lin_w"] + p["lin_b"]
    return jax.nn.log_softmax(logits, axis=-1)


# ----------------------------------- main -------------------------------------

if __name__ == "__main__":
    key = jax.random.PRNGKey(0)
    N, nfeat, nhid, nclass = 32, 16, 32, 4
    num_graphs = 2
    E_per_graph = 32

    k_x, k_e0, k_e1, k_p = jax.random.split(key, 4)
    x = jax.random.normal(k_x, (N, nfeat), jnp.float32)

    # two graphs of 16 nodes each, random within-graph edges
    half = N // 2
    src0 = jax.random.randint(k_e0, (E_per_graph,), 0, half)
    dst0 = jax.random.randint(jax.random.fold_in(k_e0, 1), (E_per_graph,), 0, half)
    src1 = jax.random.randint(k_e1, (E_per_graph,), half, N)
    dst1 = jax.random.randint(jax.random.fold_in(k_e1, 1), (E_per_graph,), half, N)
    edge_index = jnp.stack([jnp.concatenate([src0, src1]),
                            jnp.concatenate([dst0, dst1])]).astype(jnp.int32)
    edge_weight = jnp.ones((edge_index.shape[1],), jnp.float32)
    batch = jnp.concatenate([jnp.zeros(half, jnp.int32), jnp.ones(half, jnp.int32)])

    params = init_params(k_p, nfeat, nhid, nclass, n_mem=(8, 8))

    out = struct_att_graph_gnn(x, edge_index, edge_weight, batch, params,
                               num_graphs=num_graphs)
    out = jax.block_until_ready(out)

    assert out.shape == (num_graphs, nclass)
    assert bool(jnp.all(jnp.isfinite(out)))
    # rows are log-probabilities, should sum to ~1 after exp
    assert bool(jnp.allclose(jnp.sum(jnp.exp(out), axis=-1), 1.0, atol=1e-3))

    # validate the bf16-MXU / f32-accumulation kernel against an f32 reference
    ref = _reference_forward(x, edge_index, edge_weight, batch, params, num_graphs)
    max_diff = float(jnp.max(jnp.abs(out - ref)))
    assert max_diff < 1e-1, f"kernel deviates from f32 reference: max|diff|={max_diff}"

    print("KERNEL_OK")
</pallas_src>

<mosaic_0001>
module attributes {stable_mosaic.version = 11 : i64} {
  func.func private @main(%arg0: i32) attributes {dimension_semantics = [#tpu.dimension_semantics<core_parallel>], iteration_bounds = array<i64: 2>, tpu.core_type = #tpu.core_type<sc_scalar_subcore>, window_params = []} {
    return
  }
}

module attributes {stable_mosaic.version = 11 : i64} {
  func.func private @main(%arg0: i32) attributes {dimension_semantics = [#tpu.dimension_semantics<core_parallel>], iteration_bounds = array<i64: 2>, tpu.core_type = #tpu.core_type<sc_scalar_subcore>, window_params = []} {
    return
  }
}

module attributes {stable_mosaic.version = 11 : i64} {
  func.func @_gnn_kernel(%arg0: i32, %arg1: i32, %arg2: memref<128x16xbf16, #tpu.memory_space<vmem>>, %arg3: memref<128x128xbf16, #tpu.memory_space<vmem>>, %arg4: memref<2x128xbf16, #tpu.memory_space<vmem>>, %arg5: memref<128x2xf32, #tpu.memory_space<vmem>>, %arg6: memref<16x32xbf16, #tpu.memory_space<vmem>>, %arg7: memref<2x64x32xbf16, #tpu.memory_space<vmem>>, %arg8: memref<2x32x32xbf16, #tpu.memory_space<vmem>>, %arg9: memref<2x8x32xbf16, #tpu.memory_space<vmem>>, %arg10: memref<2x32x64xbf16, #tpu.memory_space<vmem>>, %arg11: memref<2x64x65xbf16, #tpu.memory_space<vmem>>, %arg12: memref<128x4xbf16, #tpu.memory_space<vmem>>, %arg13: memref<5x1x32xf32, #tpu.memory_space<vmem>>, %arg14: memref<2x1x64xf32, #tpu.memory_space<vmem>>, %arg15: memref<2x1x65xf32, #tpu.memory_space<vmem>>, %arg16: memref<1x4xf32, #tpu.memory_space<vmem>>, %arg17: memref<2x4xf32, #tpu.memory_space<vmem>>, %arg18: memref<128x32xf32, #tpu.memory_space<vmem>>, %arg19: memref<128x32xf32, #tpu.memory_space<vmem>>, %arg20: memref<2x2x64xf32, #tpu.memory_space<vmem>>) attributes {dimension_semantics = [#tpu.dimension_semantics<arbitrary>, #tpu.dimension_semantics<arbitrary>], iteration_bounds = array<i64: 2, 1>, scalar_prefetch = 0 : i64, scratch_operands = 3 : i64, tpu.core_type = #tpu.core_type<tc>, window_params = [{pipeline_mode = #tpu.pipeline_mode<synchronous>, transform_indices = @transform_0, window_bounds = array<i64: 128, 16>}, {transform_indices = @transform_1, window_bounds = array<i64: 128, 128>}, {pipeline_mode = #tpu.pipeline_mode<synchronous>, transform_indices = @transform_2, window_bounds = array<i64: 2, 128>}, {pipeline_mode = #tpu.pipeline_mode<synchronous>, transform_indices = @transform_3, window_bounds = array<i64: 128, 2>}, {pipeline_mode = #tpu.pipeline_mode<synchronous>, transform_indices = @transform_4, window_bounds = array<i64: 16, 32>}, {pipeline_mode = #tpu.pipeline_mode<synchronous>, transform_indices = @transform_5, window_bounds = array<i64: 2, 64, 32>}, {pipeline_mode = #tpu.pipeline_mode<synchronous>, transform_indices = @transform_6, window_bounds = array<i64: 2, 32, 32>}, {pipeline_mode = #tpu.pipeline_mode<synchronous>, transform_indices = @transform_7, window_bounds = array<i64: 2, 8, 32>}, {pipeline_mode = #tpu.pipeline_mode<synchronous>, transform_indices = @transform_8, window_bounds = array<i64: 2, 32, 64>}, {pipeline_mode = #tpu.pipeline_mode<synchronous>, transform_indices = @transform_9, window_bounds = array<i64: 2, 64, 65>}, {pipeline_mode = #tpu.pipeline_mode<synchronous>, transform_indices = @transform_10, window_bounds = array<i64: 128, 4>}, {pipeline_mode = #tpu.pipeline_mode<synchronous>, transform_indices = @transform_11, window_bounds = array<i64: 5, 1, 32>}, {pipeline_mode = #tpu.pipeline_mode<synchronous>, transform_indices = @transform_12, window_bounds = array<i64: 2, 1, 64>}, {pipeline_mode = #tpu.pipeline_mode<synchronous>, transform_indices = @transform_13, window_bounds = array<i64: 2, 1, 65>}, {pipeline_mode = #tpu.pipeline_mode<synchronous>, transform_indices = @transform_14, window_bounds = array<i64: 1, 4>}, {pipeline_mode = #tpu.pipeline_mode<synchronous>, transform_indices = @transform_15, window_bounds = array<i64: 2, 4>}]} {
    %c0_i32 = arith.constant 0 : i32
    %0 = arith.cmpi eq, %arg0, %c0_i32 : i32
    %c0_i32_0 = arith.constant 0 : i32
    %1 = arith.cmpi eq, %arg1, %c0_i32_0 : i32
    %2 = arith.andi %0, %1 : i1
    %3 = arith.extui %2 : i1 to i32
    %c0_i32_1 = arith.constant 0 : i32
    %4 = arith.cmpi ne, %3, %c0_i32_1 : i32
    scf.if %4 {
      %c0_12 = arith.constant 0 : index
      %c0_13 = arith.constant 0 : index
      %21 = vector.load %arg2[%c0_12, %c0_13] : memref<128x16xbf16, #tpu.memory_space<vmem>>, vector<128x16xbf16>
      %c0_14 = arith.constant 0 : index
      %c0_15 = arith.constant 0 : index
      %22 = vector.load %arg6[%c0_14, %c0_15] : memref<16x32xbf16, #tpu.memory_space<vmem>>, vector<16x32xbf16>
      %cst_16 = arith.constant dense<0.000000e+00> : vector<128x32xf32>
      %23 = tpu.matmul %21, %22, %cst_16 {dimension_numbers = #tpu.dot_dimension_numbers<[1], [0], [0], [1], [0, 0, 1, 1], [], []>} : vector<128x16xbf16>, vector<16x32xbf16>, vector<128x32xf32> -> vector<128x32xf32>
      %c0_17 = arith.constant 0 : index
      %c0_18 = arith.constant 0 : index
      %c0_19 = arith.constant 0 : index
      %24 = vector.load %arg13[%c0_17, %c0_18, %c0_19] : memref<5x1x32xf32, #tpu.memory_space<vmem>>, vector<1x1x32xf32>
      %25 = vector.shape_cast %24 : vector<1x1x32xf32> to vector<1x32xf32>
      %26 = vector.broadcast %25 : vector<1x32xf32> to vector<128x32xf32>
      %27 = arith.addf %23, %26 : vector<128x32xf32>
      %c0_20 = arith.constant 0 : index
      %c0_21 = arith.constant 0 : index
      %28 = vector.load %arg18[%c0_20, %c0_21] : memref<128x32xf32, #tpu.memory_space<vmem>>, vector<128x32xf32>
      tpu.vector_store %arg18[%c0_20, %c0_21], %27 {strides = array<i32>} : memref<128x32xf32, #tpu.memory_space<vmem>>, vector<128x32xf32>,
    } else {
    }
    %c0_i32_2 = arith.constant 0 : i32
    %5 = arith.cmpi eq, %arg1, %c0_i32_2 : i32
    %6 = arith.extui %5 : i1 to i32
    %c0_i32_3 = arith.constant 0 : i32
    %7 = arith.cmpi ne, %6, %c0_i32_3 : i32
    scf.if %7 {
      %cst_12 = arith.constant 0.000000e+00 : f32
      %21 = vector.broadcast %cst_12 : f32 to vector<128x32xf32>
      %c0_13 = arith.constant 0 : index
      %c0_14 = arith.constant 0 : index
      %22 = vector.load %arg19[%c0_13, %c0_14] : memref<128x32xf32, #tpu.memory_space<vmem>>, vector<128x32xf32>
      tpu.vector_store %arg19[%c0_13, %c0_14], %21 {strides = array<i32>} : memref<128x32xf32, #tpu.memory_space<vmem>>, vector<128x32xf32>,
    } else {
    }
    %c128_i32 = arith.constant 128 : i32
    %8 = arith.muli %arg1, %c128_i32 : i32
    %9 = tpu.assume_multiple %8, 128 : i32
    %10 = arith.index_cast %9 : i32 to index
    %c0 = arith.constant 0 : index
    %11 = vector.load %arg18[%10, %c0] : memref<128x32xf32, #tpu.memory_space<vmem>>, vector<128x32xf32>
    %12 = arith.truncf %11 : vector<128x32xf32> to vector<128x32xbf16>
    %c0_4 = arith.constant 0 : index
    %c0_5 = arith.constant 0 : index
    %13 = vector.load %arg19[%c0_4, %c0_5] : memref<128x32xf32, #tpu.memory_space<vmem>>, vector<128x32xf32>
    %c0_6 = arith.constant 0 : index
    %c0_7 = arith.constant 0 : index
    %14 = vector.load %arg3[%c0_6, %c0_7] : memref<128x128xbf16, #tpu.memory_space<vmem>>, vector<128x128xbf16>
    %cst = arith.constant dense<0.000000e+00> : vector<128x32xf32>
    %15 = tpu.matmul %14, %12, %cst {dimension_numbers = #tpu.dot_dimension_numbers<[1], [0], [0], [1], [0, 0, 1, 1], [], []>} : vector<128x128xbf16>, vector<128x32xbf16>, vector<128x32xf32> -> vector<128x32xf32>
    %16 = arith.addf %13, %15 : vector<128x32xf32>
    %c0_8 = arith.constant 0 : index
    %c0_9 = arith.constant 0 : index
    %17 = vector.load %arg19[%c0_8, %c0_9] : memref<128x32xf32, #tpu.memory_space<vmem>>, vector<128x32xf32>
    tpu.vector_store %arg19[%c0_8, %c0_9], %16 {strides = array<i32>} : memref<128x32xf32, #tpu.memory_space<vmem>>, vector<128x32xf32>,
    %c0_i32_10 = arith.constant 0 : i32
    %18 = arith.cmpi eq, %arg1, %c0_i32_10 : i32
    %19 = arith.extui %18 : i1 to i32
    %c0_i32_11 = arith.constant 0 : i32
    %20 = arith.cmpi ne, %19, %c0_i32_11 : i32
    scf.if %20 {
      %c0_12 = arith.constant 0 : index
      %c0_13 = arith.constant 0 : index
      %21 = vector.load %arg18[%c0_12, %c0_13] : memref<128x32xf32, #tpu.memory_space<vmem>>, vector<128x32xf32>
      %c0_14 = arith.constant 0 : index
      %c0_15 = arith.constant 0 : index
      %22 = vector.load %arg19[%c0_14, %c0_15] : memref<128x32xf32, #tpu.memory_space<vmem>>, vector<128x32xf32>
      %23 = arith.index_cast %arg0 : i32 to index
      %c0_16 = arith.constant 0 : index
      %c0_17 = arith.constant 0 : index
      %24 = vector.load %arg7[%23, %c0_16, %c0_17] : memref<2x64x32xbf16, #tpu.memory_space<vmem>>, vector<1x64x32xbf16>
      %25 = vector.shape_cast %24 : vector<1x64x32xbf16> to vector<64x32xbf16>
      %26 = arith.truncf %21 : vector<128x32xf32> to vector<128x32xbf16>
      %27 = vector.extract_strided_slice %25 {offsets = [0, 0], sizes = [32, 32], strides = [1, 1]} : vector<64x32xbf16> to vector<32x32xbf16>
      %cst_18 = arith.constant dense<0.000000e+00> : vector<128x32xf32>
      %28 = tpu.matmul %26, %27, %cst_18 {dimension_numbers = #tpu.dot_dimension_numbers<[1], [0], [0], [1], [0, 0, 1, 1], [], []>} : vector<128x32xbf16>, vector<32x32xbf16>, vector<128x32xf32> -> vector<128x32xf32>
      %29 = arith.truncf %22 : vector<128x32xf32> to vector<128x32xbf16>
      %30 = vector.extract_strided_slice %25 {offsets = [32, 0], sizes = [32, 32], strides = [1, 1]} : vector<64x32xbf16> to vector<32x32xbf16>
      %cst_19 = arith.constant dense<0.000000e+00> : vector<128x32xf32>
      %31 = tpu.matmul %29, %30, %cst_19 {dimension_numbers = #tpu.dot_dimension_numbers<[1], [0], [0], [1], [0, 0, 1, 1], [], []>} : vector<128x32xbf16>, vector<32x32xbf16>, vector<128x32xf32> -> vector<128x32xf32>
      %32 = arith.addf %28, %31 : vector<128x32xf32>
      %c2_i32 = arith.constant 2 : i32
      %33 = arith.muli %c2_i32, %arg0 : i32
      %c1_i32 = arith.constant 1 : i32
      %34 = arith.addi %33, %c1_i32 : i32
      %35 = arith.index_cast %34 : i32 to index
      %c0_20 = arith.constant 0 : index
      %c0_21 = arith.constant 0 : index
      %36 = vector.load %arg13[%35, %c0_20, %c0_21] : memref<5x1x32xf32, #tpu.memory_space<vmem>>, vector<1x1x32xf32>
      %37 = vector.shape_cast %36 : vector<1x1x32xf32> to vector<1x32xf32>
      %38 = vector.broadcast %37 : vector<1x32xf32> to vector<128x32xf32>
      %39 = arith.addf %32, %38 : vector<128x32xf32>
      %cst_22 = arith.constant 0.000000e+00 : f32
      %40 = vector.broadcast %cst_22 : f32 to vector<128x32xf32>
      %41 = arith.maximumf %39, %40 : vector<128x32xf32>
      %42 = arith.truncf %41 : vector<128x32xf32> to vector<128x32xbf16>
      %43 = arith.index_cast %arg0 : i32 to index
      %c0_23 = arith.constant 0 : index
      %c0_24 = arith.constant 0 : index
      %44 = vector.load %arg8[%43, %c0_23, %c0_24] : memref<2x32x32xbf16, #tpu.memory_space<vmem>>, vector<1x32x32xbf16>
      %45 = vector.shape_cast %44 : vector<1x32x32xbf16> to vector<32x32xbf16>
      %cst_25 = arith.constant dense<0.000000e+00> : vector<128x32xf32>
      %46 = tpu.matmul %42, %45, %cst_25 {dimension_numbers = #tpu.dot_dimension_numbers<[1], [0], [0], [1], [0, 0, 1, 1], [], []>} : vector<128x32xbf16>, vector<32x32xbf16>, vector<128x32xf32> -> vector<128x32xf32>
      %c2_i32_26 = arith.constant 2 : i32
      %47 = arith.muli %c2_i32_26, %arg0 : i32
      %c2_i32_27 = arith.constant 2 : i32
      %48 = arith.addi %47, %c2_i32_27 : i32
      %49 = arith.index_cast %48 : i32 to index
      %c0_28 = arith.constant 0 : index
      %c0_29 = arith.constant 0 : index
      %50 = vector.load %arg13[%49, %c0_28, %c0_29] : memref<5x1x32xf32, #tpu.memory_space<vmem>>, vector<1x1x32xf32>
      %51 = vector.shape_cast %50 : vector<1x1x32xf32> to vector<1x32xf32>
      %52 = vector.broadcast %51 : vector<1x32xf32> to vector<128x32xf32>
      %53 = arith.addf %46, %52 : vector<128x32xf32>
      %cst_30 = arith.constant 0.000000e+00 : f32
      %54 = vector.broadcast %cst_30 : f32 to vector<128x32xf32>
      %55 = arith.maximumf %53, %54 : vector<128x32xf32>
      %56 = arith.index_cast %arg0 : i32 to index
      %c0_31 = arith.constant 0 : index
      %c0_32 = arith.constant 0 : index
      %57 = vector.load %arg9[%56, %c0_31, %c0_32] : memref<2x8x32xbf16, #tpu.memory_space<vmem>>, vector<1x8x32xbf16>
      %58 = vector.shape_cast %57 : vector<1x8x32xbf16> to vector<8x32xbf16>
      %59 = arith.truncf %55 : vector<128x32xf32> to vector<128x32xbf16>
      %cst_33 = arith.constant dense<0.000000e+00> : vector<128x8xf32>
      %60 = tpu.matmul %59, %58, %cst_33 {dimension_numbers = #tpu.dot_dimension_numbers<[1], [1], [0], [0], [0, 0, 1, 0], [], []>} : vector<128x32xbf16>, vector<8x32xbf16>, vector<128x8xf32> -> vector<128x8xf32>
      %cst_34 = arith.constant dense<0xFF800000> : vector<128xf32>
      %61 = vector.multi_reduction <maximumf>, %60, %cst_34 [1] : vector<128x8xf32> to vector<128xf32>
      %62 = vector.shape_cast %61 : vector<128xf32> to vector<128x1xf32>
      %63 = vector.broadcast %62 : vector<128x1xf32> to vector<128x8xf32>
      %64 = arith.subf %60, %63 : vector<128x8xf32>
      %65 = math.exp %64 : vector<128x8xf32>
      %cst_35 = arith.constant dense<0.000000e+00> : vector<128xf32>
      %66 = vector.multi_reduction <add>, %65, %cst_35 [1] : vector<128x8xf32> to vector<128xf32>
      %67 = vector.shape_cast %66 : vector<128xf32> to vector<128x1xf32>
      %68 = tpu.reciprocal %67 {approx = true} : vector<128x1xf32> -> vector<128x1xf32>
      %69 = vector.broadcast %68 : vector<128x1xf32> to vector<128x8xf32>
      %70 = arith.mulf %65, %69 : vector<128x8xf32>
      %71 = arith.truncf %70 : vector<128x8xf32> to vector<128x8xbf16>
      %cst_36 = arith.constant dense<0.000000e+00> : vector<128x32xf32>
      %72 = tpu.matmul %71, %58, %cst_36 {dimension_numbers = #tpu.dot_dimension_numbers<[1], [0], [0], [1], [0, 0, 1, 1], [], []>} : vector<128x8xbf16>, vector<8x32xbf16>, vector<128x32xf32> -> vector<128x32xf32>
      %c0_37 = arith.constant 0 : index
      %c0_38 = arith.constant 0 : index
      %73 = vector.load %arg18[%c0_37, %c0_38] : memref<128x32xf32, #tpu.memory_space<vmem>>, vector<128x32xf32>
      tpu.vector_store %arg18[%c0_37, %c0_38], %72 {strides = array<i32>} : memref<128x32xf32, #tpu.memory_space<vmem>>, vector<128x32xf32>,
      %c0_39 = arith.constant 0 : index
      %c0_40 = arith.constant 0 : index
      %74 = vector.load %arg5[%c0_39, %c0_40] : memref<128x2xf32, #tpu.memory_space<vmem>>, vector<128x2xf32>
      %75 = arith.truncf %72 : vector<128x32xf32> to vector<128x32xbf16>
      %76 = arith.index_cast %arg0 : i32 to index
      %c0_41 = arith.constant 0 : index
      %c0_42 = arith.constant 0 : index
      %77 = vector.load %arg10[%76, %c0_41, %c0_42] : memref<2x32x64xbf16, #tpu.memory_space<vmem>>, vector<1x32x64xbf16>
      %78 = vector.shape_cast %77 : vector<1x32x64xbf16> to vector<32x64xbf16>
      %cst_43 = arith.constant dense<0.000000e+00> : vector<128x64xf32>
      %79 = tpu.matmul %75, %78, %cst_43 {dimension_numbers = #tpu.dot_dimension_numbers<[1], [0], [0], [1], [0, 0, 1, 1], [], []>} : vector<128x32xbf16>, vector<32x64xbf16>, vector<128x64xf32> -> vector<128x64xf32>
      %80 = arith.index_cast %arg0 : i32 to index
      %c0_44 = arith.constant 0 : index
      %c0_45 = arith.constant 0 : index
      %81 = vector.load %arg14[%80, %c0_44, %c0_45] : memref<2x1x64xf32, #tpu.memory_space<vmem>>, vector<1x1x64xf32>
      %82 = vector.shape_cast %81 : vector<1x1x64xf32> to vector<1x64xf32>
      %83 = vector.broadcast %82 : vector<1x64xf32> to vector<128x64xf32>
      %84 = arith.addf %79, %83 : vector<128x64xf32>
      %cst_46 = arith.constant 0.000000e+00 : f32
      %85 = vector.broadcast %cst_46 : f32 to vector<128x64xf32>
      %86 = arith.maximumf %84, %85 : vector<128x64xf32>
      %87 = arith.truncf %86 : vector<128x64xf32> to vector<128x64xbf16>
      %88 = arith.index_cast %arg0 : i32 to index
      %c0_47 = arith.constant 0 : index
      %c0_48 = arith.constant 0 : index
      %89 = vector.load %arg11[%88, %c0_47, %c0_48] : memref<2x64x65xbf16, #tpu.memory_space<vmem>>, vector<1x64x65xbf16>
      %90 = vector.shape_cast %89 : vector<1x64x65xbf16> to vector<64x65xbf16>
      %cst_49 = arith.constant dense<0.000000e+00> : vector<128x65xf32>
      %91 = tpu.matmul %87, %90, %cst_49 {dimension_numbers = #tpu.dot_dimension_numbers<[1], [0], [0], [1], [0, 0, 1, 1], [], []>} : vector<128x64xbf16>, vector<64x65xbf16>, vector<128x65xf32> -> vector<128x65xf32>
      %92 = arith.index_cast %arg0 : i32 to index
      %c0_50 = arith.constant 0 : index
      %c0_51 = arith.constant 0 : index
      %93 = vector.load %arg15[%92, %c0_50, %c0_51] : memref<2x1x65xf32, #tpu.memory_space<vmem>>, vector<1x1x65xf32>
      %94 = vector.shape_cast %93 : vector<1x1x65xf32> to vector<1x65xf32>
      %95 = vector.broadcast %94 : vector<1x65xf32> to vector<128x65xf32>
      %96 = arith.addf %91, %95 : vector<128x65xf32>
      %97 = vector.extract_strided_slice %96 {offsets = [0, 0], sizes = [128, 64], strides = [1, 1]} : vector<128x65xf32> to vector<128x64xf32>
      %98 = vector.extract_strided_slice %96 {offsets = [0, 64], sizes = [128, 1], strides = [1, 1]} : vector<128x65xf32> to vector<128x1xf32>
      %cst_52 = arith.constant 0.000000e+00 : f32
      %99 = vector.broadcast %cst_52 : f32 to vector<128x2xf32>
      %100 = arith.cmpf ogt, %74, %99 : vector<128x2xf32>
      %cst_53 = arith.constant -1.000000e+30 : f32
      %101 = vector.shape_cast %98 : vector<128x1xf32> to vector<128x1xf32>
      %102 = vector.broadcast %101 : vector<128x1xf32> to vector<128x2xf32>
      %103 = vector.broadcast %cst_53 : f32 to vector<128x2xf32>
      %104 = arith.select %100, %102, %103 : vector<128x2xi1>, vector<128x2xf32>
      %cst_54 = arith.constant dense<0xFF800000> : vector<2xf32>
      %105 = vector.multi_reduction <maximumf>, %104, %cst_54 [0] : vector<128x2xf32> to vector<2xf32>
      %106 = vector.shape_cast %105 : vector<2xf32> to vector<1x2xf32>
      %107 = vector.broadcast %106 : vector<1x2xf32> to vector<128x2xf32>
      %108 = arith.mulf %74, %107 : vector<128x2xf32>
      %cst_55 = arith.constant dense<0.000000e+00> : vector<128xf32>
      %109 = vector.multi_reduction <add>, %108, %cst_55 [1] : vector<128x2xf32> to vector<128xf32>
      %110 = vector.shape_cast %109 : vector<128xf32> to vector<128x1xf32>
      %111 = arith.subf %98, %110 : vector<128x1xf32>
      %cst_56 = arith.constant 0.000000e+00 : f32
      %112 = vector.broadcast %cst_56 : f32 to vector<128x1xf32>
      %113 = arith.minimumf %111, %112 : vector<128x1xf32>
      %114 = math.exp %113 : vector<128x1xf32>
      %115 = vector.broadcast %114 : vector<128x1xf32> to vector<128x2xf32>
      %116 = arith.mulf %74, %115 : vector<128x2xf32>
      %cst_57 = arith.constant dense<0.000000e+00> : vector<2xf32>
      %117 = vector.multi_reduction <add>, %116, %cst_57 [0] : vector<128x2xf32> to vector<2xf32>
      %118 = vector.shape_cast %117 : vector<2xf32> to vector<1x2xf32>
      %119 = tpu.reciprocal %118 {approx = true} : vector<1x2xf32> -> vector<1x2xf32>
      %120 = vector.broadcast %119 : vector<1x2xf32> to vector<128x2xf32>
      %121 = arith.mulf %74, %120 : vector<128x2xf32>
      %cst_58 = arith.constant dense<0.000000e+00> : vector<128xf32>
      %122 = vector.multi_reduction <add>, %121, %cst_58 [1] : vector<128x2xf32> to vector<128xf32>
      %123 = vector.shape_cast %122 : vector<128xf32> to vector<128x1xf32>
      %124 = arith.mulf %114, %123 : vector<128x1xf32>
      %c0_59 = arith.constant 0 : index
      %c0_60 = arith.constant 0 : index
      %125 = vector.load %arg4[%c0_59, %c0_60] : memref<2x128xbf16, #tpu.memory_space<vmem>>, vector<2x128xbf16>
      %126 = vector.broadcast %124 : vector<128x1xf32> to vector<128x64xf32>
      %127 = arith.mulf %126, %97 : vector<128x64xf32>
      %128 = arith.truncf %127 : vector<128x64xf32> to vector<128x64xbf16>
      %cst_61 = arith.constant dense<0.000000e+00> : vector<2x64xf32>
      %129 = tpu.matmul %125, %128, %cst_61 {dimension_numbers = #tpu.dot_dimension_numbers<[1], [0], [0], [1], [0, 0, 1, 1], [], []>} : vector<2x128xbf16>, vector<128x64xbf16>, vector<2x64xf32> -> vector<2x64xf32>
      %130 = arith.index_cast %arg0 : i32 to index
      %c0_62 = arith.constant 0 : index
      %c0_63 = arith.constant 0 : index
      %131 = vector.load %arg20[%130, %c0_62, %c0_63] : memref<2x2x64xf32, #tpu.memory_space<vmem>>, vector<1x2x64xf32>
      %132 = vector.shape_cast %131 : vector<1x2x64xf32> to vector<2x64xf32>
      %133 = vector.shape_cast %129 : vector<2x64xf32> to vector<1x2x64xf32>
      tpu.vector_store %arg20[%130, %c0_62, %c0_63], %133 {strides = array<i32>} : memref<2x2x64xf32, #tpu.memory_space<vmem>>, vector<1x2x64xf32>,
      %c1_i32_64 = arith.constant 1 : i32
      %134 = arith.cmpi eq, %arg0, %c1_i32_64 : i32
      %135 = arith.extui %134 : i1 to i32
      %c0_i32_65 = arith.constant 0 : i32
      %136 = arith.cmpi ne, %135, %c0_i32_65 : i32
      scf.if %136 {
        %c0_66 = arith.constant 0 : index
        %c0_67 = arith.constant 0 : index
        %c0_68 = arith.constant 0 : index
        %137 = vector.load %arg20[%c0_66, %c0_67, %c0_68] : memref<2x2x64xf32, #tpu.memory_space<vmem>>, vector<1x2x64xf32>
        %138 = vector.shape_cast %137 : vector<1x2x64xf32> to vector<2x64xf32>
        %c0_69 = arith.constant 0 : index
        %c0_70 = arith.constant 0 : index
        %139 = vector.load %arg12[%c0_69, %c0_70] : memref<128x4xbf16, #tpu.memory_space<vmem>>, vector<128x4xbf16>
        %140 = arith.truncf %138 : vector<2x64xf32> to vector<2x64xbf16>
        %141 = vector.extract_strided_slice %139 {offsets = [0, 0], sizes = [64, 4], strides = [1, 1]} : vector<128x4xbf16> to vector<64x4xbf16>
        %cst_71 = arith.constant dense<0.000000e+00> : vector<2x4xf32>
        %142 = tpu.matmul %140, %141, %cst_71 {dimension_numbers = #tpu.dot_dimension_numbers<[1], [0], [0], [1], [0, 0, 1, 1], [], []>} : vector<2x64xbf16>, vector<64x4xbf16>, vector<2x4xf32> -> vector<2x4xf32>
        %143 = arith.truncf %129 : vector<2x64xf32> to vector<2x64xbf16>
        %144 = vector.extract_strided_slice %139 {offsets = [64, 0], sizes = [64, 4], strides = [1, 1]} : vector<128x4xbf16> to vector<64x4xbf16>
        %cst_72 = arith.constant dense<0.000000e+00> : vector<2x4xf32>
        %145 = tpu.matmul %143, %144, %cst_72 {dimension_numbers = #tpu.dot_dimension_numbers<[1], [0], [0], [1], [0, 0, 1, 1], [], []>} : vector<2x64xbf16>, vector<64x4xbf16>, vector<2x4xf32> -> vector<2x4xf32>
        %146 = arith.addf %142, %145 : vector<2x4xf32>
        %c0_73 = arith.constant 0 : index
        %c0_74 = arith.constant 0 : index
        %147 = vector.load %arg16[%c0_73, %c0_74] : memref<1x4xf32, #tpu.memory_space<vmem>>, vector<1x4xf32>
        %148 = vector.broadcast %147 : vector<1x4xf32> to vector<2x4xf32>
        %149 = arith.addf %146, %148 : vector<2x4xf32>
        %cst_75 = arith.constant dense<0xFF800000> : vector<2xf32>
        %150 = vector.multi_reduction <maximumf>, %149, %cst_75 [1] : vector<2x4xf32> to vector<2xf32>
        %151 = vector.shape_cast %150 : vector<2xf32> to vector<2x1xf32>
        %152 = vector.broadcast %151 : vector<2x1xf32> to vector<2x4xf32>
        %153 = arith.subf %149, %152 : vector<2x4xf32>
        %154 = math.exp %153 : vector<2x4xf32>
        %cst_76 = arith.constant dense<0.000000e+00> : vector<2xf32>
        %155 = vector.multi_reduction <add>, %154, %cst_76 [1] : vector<2x4xf32> to vector<2xf32>
        %156 = vector.shape_cast %155 : vector<2xf32> to vector<2x1xf32>
        %157 = math.log %156 : vector<2x1xf32>
        %158 = vector.broadcast %157 : vector<2x1xf32> to vector<2x4xf32>
        %159 = arith.subf %153, %158 : vector<2x4xf32>
        %c0_77 = arith.constant 0 : index
        %c0_78 = arith.constant 0 : index
        %160 = vector.load %arg17[%c0_77, %c0_78] : memref<2x4xf32, #tpu.memory_space<vmem>>, vector<2x4xf32>
        tpu.vector_store %arg17[%c0_77, %c0_78], %159 {strides = array<i32>} : memref<2x4xf32, #tpu.memory_space<vmem>>, vector<2x4xf32>,
      } else {
      }
    } else {
    }
    return
  }
  func.func @transform_0(%arg0: i32, %arg1: i32) -> (i32, i32) {
    %c0_i32 = arith.constant 0 : i32
    %c0_i32_0 = arith.constant 0 : i32
    %c0_i32_1 = arith.constant 0 : i32
    return %c0_i32, %c0_i32_0 : i32, i32
  }
  func.func @transform_1(%arg0: i32, %arg1: i32) -> (i32, i32) {
    %c0_i32 = arith.constant 0 : i32
    %c0_i32_0 = arith.constant 0 : i32
    return %c0_i32, %arg1 : i32, i32
  }
  func.func @transform_2(%arg0: i32, %arg1: i32) -> (i32, i32) {
    %c0_i32 = arith.constant 0 : i32
    %c0_i32_0 = arith.constant 0 : i32
    %c0_i32_1 = arith.constant 0 : i32
    return %c0_i32, %c0_i32_0 : i32, i32
  }
  func.func @transform_3(%arg0: i32, %arg1: i32) -> (i32, i32) {
    %c0_i32 = arith.constant 0 : i32
    %c0_i32_0 = arith.constant 0 : i32
    %c0_i32_1 = arith.constant 0 : i32
    return %c0_i32, %c0_i32_0 : i32, i32
  }
  func.func @transform_4(%arg0: i32, %arg1: i32) -> (i32, i32) {
    %c0_i32 = arith.constant 0 : i32
    %c0_i32_0 = arith.constant 0 : i32
    %c0_i32_1 = arith.constant 0 : i32
    return %c0_i32, %c0_i32_0 : i32, i32
  }
  func.func @transform_5(%arg0: i32, %arg1: i32) -> (i32, i32, i32) {
    %c0_i32 = arith.constant 0 : i32
    %c0_i32_0 = arith.constant 0 : i32
    %c0_i32_1 = arith.constant 0 : i32
    %c0_i32_2 = arith.constant 0 : i32
    return %c0_i32, %c0_i32_0, %c0_i32_1 : i32, i32, i32
  }
  func.func @transform_6(%arg0: i32, %arg1: i32) -> (i32, i32, i32) {
    %c0_i32 = arith.constant 0 : i32
    %c0_i32_0 = arith.constant 0 : i32
    %c0_i32_1 = arith.constant 0 : i32
    %c0_i32_2 = arith.constant 0 : i32
    return %c0_i32, %c0_i32_0, %c0_i32_1 : i32, i32, i32
  }
  func.func @transform_7(%arg0: i32, %arg1: i32) -> (i32, i32, i32) {
    %c0_i32 = arith.constant 0 : i32
    %c0_i32_0 = arith.constant 0 : i32
    %c0_i32_1 = arith.constant 0 : i32
    %c0_i32_2 = arith.constant 0 : i32
    return %c0_i32, %c0_i32_0, %c0_i32_1 : i32, i32, i32
  }
  func.func @transform_8(%arg0: i32, %arg1: i32) -> (i32, i32, i32) {
    %c0_i32 = arith.constant 0 : i32
    %c0_i32_0 = arith.constant 0 : i32
    %c0_i32_1 = arith.constant 0 : i32
    %c0_i32_2 = arith.constant 0 : i32
    return %c0_i32, %c0_i32_0, %c0_i32_1 : i32, i32, i32
  }
  func.func @transform_9(%arg0: i32, %arg1: i32) -> (i32, i32, i32) {
    %c0_i32 = arith.constant 0 : i32
    %c0_i32_0 = arith.constant 0 : i32
    %c0_i32_1 = arith.constant 0 : i32
    %c0_i32_2 = arith.constant 0 : i32
    return %c0_i32, %c0_i32_0, %c0_i32_1 : i32, i32, i32
  }
  func.func @transform_10(%arg0: i32, %arg1: i32) -> (i32, i32) {
    %c0_i32 = arith.constant 0 : i32
    %c0_i32_0 = arith.constant 0 : i32
    %c0_i32_1 = arith.constant 0 : i32
    return %c0_i32, %c0_i32_0 : i32, i32
  }
  func.func @transform_11(%arg0: i32, %arg1: i32) -> (i32, i32, i32) {
    %c0_i32 = arith.constant 0 : i32
    %c0_i32_0 = arith.constant 0 : i32
    %c0_i32_1 = arith.constant 0 : i32
    %c0_i32_2 = arith.constant 0 : i32
    return %c0_i32, %c0_i32_0, %c0_i32_1 : i32, i32, i32
  }
  func.func @transform_12(%arg0: i32, %arg1: i32) -> (i32, i32, i32) {
    %c0_i32 = arith.constant 0 : i32
    %c0_i32_0 = arith.constant 0 : i32
    %c0_i32_1 = arith.constant 0 : i32
    %c0_i32_2 = arith.constant 0 : i32
    return %c0_i32, %c0_i32_0, %c0_i32_1 : i32, i32, i32
  }
  func.func @transform_13(%arg0: i32, %arg1: i32) -> (i32, i32, i32) {
    %c0_i32 = arith.constant 0 : i32
    %c0_i32_0 = arith.constant 0 : i32
    %c0_i32_1 = arith.constant 0 : i32
    %c0_i32_2 = arith.constant 0 : i32
    return %c0_i32, %c0_i32_0, %c0_i32_1 : i32, i32, i32
  }
  func.func @transform_14(%arg0: i32, %arg1: i32) -> (i32, i32) {
    %c0_i32 = arith.constant 0 : i32
    %c0_i32_0 = arith.constant 0 : i32
    %c0_i32_1 = arith.constant 0 : i32
    return %c0_i32, %c0_i32_0 : i32, i32
  }
  func.func @transform_15(%arg0: i32, %arg1: i32) -> (i32, i32) {
    %c0_i32 = arith.constant 0 : i32
    %c0_i32_0 = arith.constant 0 : i32
    %c0_i32_1 = arith.constant 0 : i32
    return %c0_i32, %c0_i32_0 : i32, i32
  }
}

</mosaic_0001>

<bundles_post_ra>
// kernel: struct_att_graph_gnn.1
= control target key start
LH: loop header
LB: loop body
LE: loop exit
PB: predicated region body
PF: predicated region fallthrough
CT: control target
= control target key end

     0   :  { %20 = vsyncpa [#allocation6], 0  ;;  %s4031_s18 = smov 0   ;;  %s4033_s19 = smov 0   ;;  %s4950_s0 = inlined_call_operand.vmem [shape: bf16[128,16], index: 0, kind: input, shape index: {}]   ;;  %s4951_s1 = inlined_call_operand.vmem [shape: bf16[128,128], index: 1, kind: input, shape index: {}]   ;;  %s4952_s2 = inlined_call_operand.vmem [shape: bf16[2,128], index: 2, kind: input, shape index: {}]   ;;  %s4953_s3 = inlined_call_operand.vmem [shape: f32[128,2], index: 3, kind: input, shape index: {}]   ;;  %s4954_s4 = inlined_call_operand.vmem [shape: bf16[16,32], index: 4, kind: input, shape index: {}]   ;;  %s4955_s5 = inlined_call_operand.vmem [shape: bf16[2,64,32], index: 5, kind: input, shape index: {}]   ;;  %s4956_s6 = inlined_call_operand.vmem [shape: bf16[2,32,32], index: 6, kind: input, shape index: {}]   ;;  %s4957_s7 = inlined_call_operand.vmem [shape: bf16[2,8,32], index: 7, kind: input, shape index: {}]   ;;  %s4958_s8 = inlined_call_operand.vmem [shape: bf16[2,32,64], index: 8, kind: input, shape index: {}]   ;;  %s4959_s9 = inlined_call_operand.vmem [shape: bf16[2,64,65], index: 9, kind: input, shape index: {}]   ;;  %s4960_s10 = inlined_call_operand.vmem [shape: bf16[128,4], index: 10, kind: input, shape index: {}]   ;;  %s4961_s11 = inlined_call_operand.vmem [shape: f32[5,1,32], index: 11, kind: input, shape index: {}]   ;;  %s4962_s12 = inlined_call_operand.vmem [shape: f32[2,1,64], index: 12, kind: input, shape index: {}]   ;;  %s4963_s13 = inlined_call_operand.vmem [shape: f32[2,1,65], index: 13, kind: input, shape index: {}]   ;;  %s4964_s14 = inlined_call_operand.vmem [shape: f32[1,4], index: 14, kind: input, shape index: {}]   ;;  %s4965_s15 = inlined_call_operand.hbm [shape: f32[2,4], index: 15, kind: output, shape index: {}]  }
   0x1   :  { %s4035_s20 = smov 0  }
   0x2 LB: > { %s3224_s21 = sadd.s32 4294967295, %s3943_s20   ;;  %s38_s22 = sadd.s32 1, %s3939_s19  ;;  %s3943_s20 = sphi %s4035_s20, %s26_s20   ;;  %s3939_s19 = sphi %s4033_s19, %s4980_s19   ;;  %s3935_s18 = sphi %s4031_s18, %s4979_s18  }
   0x3   : > { %p40_p0 = scmp.ge.s32.totalorder %s38_s22, 2  ;;  %p3227_p1 = scmp.ge.s32.totalorder %s3943_s20, 1 }
   0x4   : > { %p444_p2 = scmp.lt.s32.totalorder %s3943_s20, 3 }
   0x5   : > { %s4982_s22 = smov (%p40_p0, %s38_s22), 0 }
   0x6   : > { %p445_p3 = pnand %p3227_p1, %p444_p2 }
   0x8   : > { %448 = sbr.rel (%p445_p3) target bundleno = 3622 (0xe26), region = 80 }
   0xd   : > { %p491_p4 = scmp.eq.s32.totalorder %s3935_s18, 0 }
   0xe   : > { %v3752_v0 = vld [vmem:[%s4954_s4] sm:$0xff] (%p491_p4)   ;;  %vm568_vm0 = vcmask (%p491_p4), 130048   ;;  %v3755_v3 = vld [vmem:[%s4950_s0 + $0x8] sm:$0xff] (%p491_p4)   ;;  %v3757_v5 = vld [vmem:[%s4950_s0 + $0x10] sm:$0xff] (%p491_p4)   ;;  %vm690_vm1 = vcmask (%p491_p4), 261120  }
   0xf   : > { %496 = sbr.rel (!%p491_p4) target bundleno = 229 (0xe5), region = 84  ;;  %v3753_v1 = vld [vmem:[%s4950_s0] sm:$0xff] (%p491_p4)   ;;  %3474 = vmatprep.subr.bf16.mxu0 (%p491_p4), %v3752_v0  ;;  %3708 = vmatprep.subr.bf16.mxu1 (%p491_p4), %v3752_v0  ;;  %v3756_v4 = vld [vmem:[%s4950_s0 + $0x28] sm:$0xff] (%p491_p4)   ;;  %v3758_v6 = vld [vmem:[%s4950_s0 + $0x30] sm:$0xff] (%p491_p4)  }
  0x10   : > { %v3754_v2 = vld [vmem:[%s4950_s0 + $0x20] sm:$0xff] (%p491_p4)   ;;  %3475 = vmatpush3.bf16.msra.mxu0 (%p491_p4), %v3752_v0  ;;  %3709 = vmatpush3.bf16.msra.mxu1 (%p491_p4), %v3752_v0  ;;  %v3759_v7 = vld [vmem:[%s4950_s0 + $0x18] sm:$0xff] (%p491_p4)  }
  0x11   : > { %3476 = vmatprep.mubr.msk.bf16.mxu0 (%p491_p4), %vm568_vm0, %v3753_v1  ;;  %3484 = vmatprep.mubr.msk.bf16.mxu1 (%p491_p4), %vm568_vm0, %v3754_v2  ;;  %v3760_v8 = vld [vmem:[%s4950_s0 + $0x38] sm:$0xff] (%p491_p4)   ;;  %v3229_v9 = vld [vmem:[%s4961_s11] ss:$0 sm:$0xff] (%p491_p4) }
  0x13   : > { %3477 = vmatmul.mubr.msk.bf16.vlgmr.msra.gmra.mxu0 (%p491_p4), %vm568_vm0, %v3755_v3  ;;  %3485 = vmatmul.mubr.msk.bf16.vlgmr.msra.gmra.mxu1 (%p491_p4), %vm568_vm0, %v3756_v4 }
  0x14   : > { %3480 = vmatprep.mubr.msk.bf16.mxu0 %vm568_vm0, %v3757_v5  ;;  %3488 = vmatprep.mubr.msk.bf16.mxu1 %vm568_vm0, %v3758_v6 }
  0x1b   : > { %3481 = vmatmul.mubr.msk.bf16.gmra.mxu0 %vm568_vm0, %v3759_v7  ;;  %3489 = vmatmul.mubr.msk.bf16.gmra.mxu1 %vm568_vm0, %v3760_v8 }
  0xd3   : > { %v3478_v10 = vpop.f32.mrf.mxu0  ;;  %v3486_v11 = vpop.f32.mrf.mxu1 }
  0xd4   : > { %v636_v12 = vadd.f32 %v3478_v10, %v3229_v9  ;;  %v668_v13 = vadd.f32 %v3486_v11, %v3229_v9 }
  0xd5   : > { %v627_v14 = vpop.f32.mrf.mxu0  ;;  %v659_v15 = vpop.f32.mrf.mxu1 }
  0xd6   : > { %693 = vst.msk [vmem:[#allocation2 + $0x10] sm:$0xff] %vm690_vm1, %v636_v12  ;;  %701 = vst.msk [vmem:[#allocation2 + $0x50] sm:$0xff] %vm690_vm1, %v668_v13  ;;  %v628_v16 = vadd.f32 %v3229_v9, %v627_v14  ;;  %v660_v17 = vadd.f32 %v3229_v9, %v659_v15 }
  0xd7   : > { %v3479_v18 = vpop.f32.mrf.mxu0  ;;  %v3487_v19 = vpop.f32.mrf.mxu1 }
  0xd8   : > { %691 = vst.msk [vmem:[#allocation2] sm:$0xff] %vm690_vm1, %v628_v16  ;;  %699 = vst.msk [vmem:[#allocation2 + $0x40] sm:$0xff] %vm690_vm1, %v660_v17  ;;  %v639_v20 = vadd.f32 %v3479_v18, %v3229_v9  ;;  %v671_v21 = vadd.f32 %v3487_v19, %v3229_v9 }
  0xd9   : > { %v630_v22 = vpop.f32.mrf.mxu0  ;;  %v662_v23 = vpop.f32.mrf.mxu1 }
  0xda   : > { %694 = vst.msk [vmem:[#allocation2 + $0x18] sm:$0xff] %vm690_vm1, %v639_v20  ;;  %702 = vst.msk [vmem:[#allocation2 + $0x58] sm:$0xff] %vm690_vm1, %v671_v21  ;;  %v631_v24 = vadd.f32 %v3229_v9, %v630_v22  ;;  %v663_v25 = vadd.f32 %v3229_v9, %v662_v23 }
  0xdb   : > { %v3482_v26 = vpop.f32.mrf.mxu0  ;;  %v3490_v27 = vpop.f32.mrf.mxu1 }
  0xdc   : > { %692 = vst.msk [vmem:[#allocation2 + $0x8] sm:$0xff] %vm690_vm1, %v631_v24  ;;  %700 = vst.msk [vmem:[#allocation2 + $0x48] sm:$0xff] %vm690_vm1, %v663_v25  ;;  %v652_v28 = vadd.f32 %v3482_v26, %v3229_v9  ;;  %v684_v29 = vadd.f32 %v3490_v27, %v3229_v9 }
  0xdd   : > { %v643_v30 = vpop.f32.mrf.mxu0  ;;  %v675_v31 = vpop.f32.mrf.mxu1 }
  0xde   : > { %697 = vst.msk [vmem:[#allocation2 + $0x30] sm:$0xff] %vm690_vm1, %v652_v28  ;;  %705 = vst.msk [vmem:[#allocation2 + $0x70] sm:$0xff] %vm690_vm1, %v684_v29  ;;  %v644_v32 = vadd.f32 %v3229_v9, %v643_v30  ;;  %v676_v33 = vadd.f32 %v3229_v9, %v675_v31 }
  0xdf   : > { %v3483_v34 = vpop.f32.mrf.mxu0  ;;  %v3491_v35 = vpop.f32.mrf.mxu1 }
  0xe0   : > { %695 = vst.msk [vmem:[#allocation2 + $0x20] sm:$0xff] %vm690_vm1, %v644_v32  ;;  %703 = vst.msk [vmem:[#allocation2 + $0x60] sm:$0xff] %vm690_vm1, %v676_v33  ;;  %v655_v36 = vadd.f32 %v3483_v34, %v3229_v9  ;;  %v687_v37 = vadd.f32 %v3491_v35, %v3229_v9 }
  0xe1   : > { %v646_v38 = vpop.f32.mrf.mxu0  ;;  %v678_v39 = vpop.f32.mrf.mxu1 }
  0xe2   : > { %698 = vst.msk [vmem:[#allocation2 + $0x38] sm:$0xff] %vm690_vm1, %v655_v36  ;;  %706 = vst.msk [vmem:[#allocation2 + $0x78] sm:$0xff] %vm690_vm1, %v687_v37  ;;  %v647_v40 = vadd.f32 %v3229_v9, %v646_v38  ;;  %v679_v41 = vadd.f32 %v3229_v9, %v678_v39 }
  0xe4   : > { %696 = vst.msk [vmem:[#allocation2 + $0x28] sm:$0xff] %vm690_vm1, %v647_v40  ;;  %704 = vst.msk [vmem:[#allocation2 + $0x68] sm:$0xff] %vm690_vm1, %v679_v41 }
  0xe5 PF: > { %v743_v42 = vld [vmem:[#allocation2 + $0x70] sm:$0xff]  ;;  %vm710_vm2 = vcmask 261120   ;;  %v4966_v47 = vmov 0.0   ;;  %v740_v50 = vld [vmem:[#allocation2 + $0x58] sm:$0xff]  ;;  %v737_v51 = vld [vmem:[#allocation2 + $0x40] sm:$0xff]  ;;  %s3356_s29 = sshll.u32 %s3935_s18, 5  ;;  %s1996_s27 = scalar_lea.vmem %s4962_s12, %s3935_s18 }
  0xe6   : > { %713 = vst.msk [vmem:[#allocation3 + $0x10] sm:$0xff] %vm710_vm2, %v4966_v47  ;;  %711 = vst.msk [vmem:[#allocation3] sm:$0xff] %vm710_vm2, %v4966_v47  ;;  %v739_v49 = vld [vmem:[#allocation2 + $0x50] sm:$0xff]  ;;  %v738_v53 = vld [vmem:[#allocation2 + $0x48] sm:$0xff]  ;;  %s4199_s17 = scalar_lea.vmem %s4955_s5, %s3356_s29  ;;  %s4206_s25 = scalar_lea.vmem %s4959_s9, %s3356_s29  ;;  %vm1641_vm3 = vcmask 64512   ;;  %vm1850_vm4 = vcmask 1043456  }
  0xe7   : > { %v741_v44 = vld [vmem:[#allocation2 + $0x60] sm:$0xff]  ;;  %712 = vst.msk [vmem:[#allocation3 + $0x8] sm:$0xff] %vm710_vm2, %v4966_v47  ;;  %714 = vst.msk [vmem:[#allocation3 + $0x18] sm:$0xff] %vm710_vm2, %v4966_v47  ;;  %v4146_v52 = vpack.c.bf16 %v740_v50, %v739_v49  ;;  %v4153_v55 = vpack.c.bf16 %v738_v53, %v737_v51  ;;  %v735_v56 = vld [vmem:[#allocation2 + $0x30] sm:$0xff]  ;;  %s3357_s26 = sshll.u32 %s3935_s18, 4  ;;  %s3277_s30 = sshll.u32 %s3935_s18, 1 }
  0xe8   : > { %715 = vst.msk [vmem:[#allocation3 + $0x20] sm:$0xff] %vm710_vm2, %v4966_v47  ;;  %716 = vst.msk [vmem:[#allocation3 + $0x28] sm:$0xff] %vm710_vm2, %v4966_v47  ;;  %v3763_v54 = vld [vmem:[%s4951_s1] sm:$0xff]   ;;  %v731_v62 = vld [vmem:[#allocation2 + $0x10] sm:$0xff]  ;;  %s1343_s29 = scalar_lea.vmem %s4956_s6, %s3357_s26  ;;  %s4270_s23 = scalar_lea.vmem %s4961_s11, %s3277_s30  ;;  %vm2203_vm5 = vcmask 523264   ;;  %vm2437_vm8 = vcmask 15360  }
  0xe9   : > { %v744_v43 = vld [vmem:[#allocation2 + $0x78] sm:$0xff]  ;;  %717 = vst.msk [vmem:[#allocation3 + $0x30] sm:$0xff] %vm710_vm2, %v4966_v47  ;;  %718 = vst.msk [vmem:[#allocation3 + $0x38] sm:$0xff] %vm710_vm2, %v4966_v47  ;;  %3508 = vmatprep.mubr.bf16.mxu0 %v3763_v54  ;;  %v733_v59 = vld [vmem:[#allocation2 + $0x20] sm:$0xff]  ;;  %s3296_s24 = sshll.u32 %s3935_s18, 2  ;;  %s2962_s28 = scalar_lea.vmem [#allocation4], %s3277_s30 }
  0xea   : > { %v4107_v45 = vpack.c.bf16 %v744_v43, %v743_v42  ;;  %719 = vst.msk [vmem:[#allocation3 + $0x40] sm:$0xff] %vm710_vm2, %v4966_v47  ;;  %720 = vst.msk [vmem:[#allocation3 + $0x48] sm:$0xff] %vm710_vm2, %v4966_v47  ;;  %v736_v57 = vld [vmem:[#allocation2 + $0x38] sm:$0xff]  ;;  %v729_v1 = vld [vmem:[#allocation2] sm:$0xff]  ;;  %p3339_p5 = scmp.ne.s32.totalorder %s3935_s18, 1 }
  0xeb   : > { %v742_v46 = vld [vmem:[#allocation2 + $0x68] sm:$0xff]  ;;  %721 = vst.msk [vmem:[#allocation3 + $0x50] sm:$0xff] %vm710_vm2, %v4966_v47  ;;  %722 = vst.msk [vmem:[#allocation3 + $0x58] sm:$0xff] %vm710_vm2, %v4966_v47  ;;  %v4157_v58 = vpack.c.bf16 %v736_v57, %v735_v56  ;;  %v732_v63 = vld [vmem:[#allocation2 + $0x18] sm:$0xff] }
  0xec   : > { %723 = vst.msk [vmem:[#allocation3 + $0x60] sm:$0xff] %vm710_vm2, %v4966_v47  ;;  %724 = vst.msk [vmem:[#allocation3 + $0x68] sm:$0xff] %vm710_vm2, %v4966_v47  ;;  %v4141_v48 = vpack.c.bf16 %v742_v46, %v741_v44  ;;  %3492 = vmatprep.subr.bf16.mxu0 %v4107_v45  ;;  %v734_v60 = vld [vmem:[#allocation2 + $0x28] sm:$0xff]  ;;  %v4165_v0 = vpack.c.bf16 %v732_v63, %v731_v62  ;;  %v3765_v5 = vld [vmem:[%s4951_s1 + $0x10] sm:$0xff]  }
  0xed   : > { %725 = vst.msk [vmem:[#allocation3 + $0x70] sm:$0xff] %vm710_vm2, %v4966_v47  ;;  %726 = vst.msk [vmem:[#allocation3 + $0x78] sm:$0xff] %vm710_vm2, %v4966_v47  ;;  %3493 = vmatpush3.bf16.msra.mxu0 %v4107_v45  ;;  %v4161_v61 = vpack.c.bf16 %v734_v60, %v733_v59  ;;  %v730_v2 = vld [vmem:[#allocation2 + $0x8] sm:$0xff]  ;;  %v3766_v6 = vld [vmem:[%s4951_s1 + $0x18] sm:$0xff]  }
  0xee   : > { %3494 = vmatprep.subr.bf16.mxu0 %v4141_v48  ;;  %v4169_v3 = vpack.c.bf16 %v730_v2, %v729_v1  ;;  %v3764_v4 = vld [vmem:[%s4951_s1 + $0x8] sm:$0xff]   ;;  %v3767_v7 = vld [vmem:[%s4951_s1 + $0x20] sm:$0xff]   ;;  %v3769_v9 = vld [vmem:[%s4951_s1 + $0x30] sm:$0xff]  }
  0xef   : > { %v3768_v8 = vld [vmem:[%s4951_s1 + $0x28] sm:$0xff]   ;;  %v3770_v10 = vld [vmem:[%s4951_s1 + $0x38] sm:$0xff]   ;;  %v3772_v12 = vld [vmem:[%s4199_s17 + $0x10] sm:$0xff]  }
  0xf0   : > { %v3771_v11 = vld [vmem:[%s4199_s17 + $0x18] sm:$0xff]   ;;  %v3773_v13 = vld [vmem:[%s4199_s17 + $0x8] sm:$0xff]   ;;  %v755_v14 = vld [vmem:[#allocation3 + $0x10] sm:$0xff] }
  0xf1   : > { %3495 = vmatpush3.bf16.msra.mxu0 %v4141_v48  ;;  %3524 = vmatprep.subr.bf16.mxu1 %v3771_v11  ;;  %v753_v16 = vld [vmem:[#allocation3] sm:$0xff]  ;;  %v756_v19 = vld [vmem:[#allocation3 + $0x18] sm:$0xff]  ;;  %v754_v22 = vld [vmem:[#allocation3 + $0x8] sm:$0xff] }
  0xf2   : > { %3496 = vmatprep.subr.bf16.mxu0 %v4146_v52  ;;  %3525 = vmatpush3.bf16.msra.mxu1 %v3771_v11  ;;  %v759_v25 = vld [vmem:[#allocation3 + $0x30] sm:$0xff]  ;;  %v757_v28 = vld [vmem:[#allocation3 + $0x20] sm:$0xff]  ;;  %v760_v31 = vld [vmem:[#allocation3 + $0x38] sm:$0xff] }
  0xf3   : > { %3526 = vmatprep.subr.bf16.mxu1 %v3772_v12  ;;  %v758_v34 = vld [vmem:[#allocation3 + $0x28] sm:$0xff]  ;;  %v763_v37 = vld [vmem:[#allocation3 + $0x50] sm:$0xff]  ;;  %v761_v41 = vld [vmem:[#allocation3 + $0x40] sm:$0xff] }
  0xf4   : > { %v764_v51 = vld [vmem:[#allocation3 + $0x58] sm:$0xff]  ;;  %v3774_v54 = vld [vmem:[%s4199_s17] sm:$0xff]   ;;  %v762_v59 = vld [vmem:[#allocation3 + $0x48] sm:$0xff] }
  0xf5   : > { %3497 = vmatpush3.bf16.msra.mxu0 %v4146_v52  ;;  %v767_v63 = vld [vmem:[#allocation3 + $0x70] sm:$0xff] }
  0xf6   : > { %3498 = vmatprep.subr.bf16.mxu0 %v4153_v55  ;;  %3527 = vmatpush3.bf16.msra.mxu1 %v3772_v12  ;;  %v768_v12 = vld [vmem:[#allocation3 + $0x78] sm:$0xff] }
  0xf7   : > { %3544 = vmatprep.subr.bf16.mxu1 %v3773_v13 }
  0xf9   : > { %3499 = vmatpush3.bf16.msra.mxu0 %v4153_v55 }
  0xfa   : > { %3500 = vmatprep.subr.bf16.mxu0 %v4157_v58 }
  0xfd   : > { %3501 = vmatpush3.bf16.msra.mxu0 %v4157_v58 }
  0xfe   : > { %3502 = vmatprep.subr.bf16.mxu0 %v4161_v61 }
 0x101   : > { %3503 = vmatpush3.bf16.msra.mxu0 %v4161_v61 }
 0x102   : > { %3504 = vmatprep.subr.bf16.mxu0 %v4165_v0 }
 0x105   : > { %3505 = vmatpush3.bf16.msra.mxu0 %v4165_v0 }
 0x106   : > { %3506 = vmatprep.subr.bf16.mxu0 %v4169_v3 }
 0x109   : > { %3507 = vmatpush3.bf16.msra.mxu0 %v4169_v3 }
 0x10c   : > { %3509 = vmatmul.mubr.bf16.vlgmr.msra.gmra.mxu0 %v3764_v4 }
 0x10d   : > { %3512 = vmatprep.mubr.bf16.mxu0 %v3765_v5  ;;  %v765_v5 = vld [vmem:[#allocation3 + $0x60] sm:$0xff] }
 0x114   : > { %3513 = vmatmul.mubr.bf16.gmra.mxu0 %v3766_v6 }
 0x115   : > { %3516 = vmatprep.mubr.bf16.mxu0 %v3767_v7 }
 0x11c   : > { %3517 = vmatmul.mubr.bf16.gmra.mxu0 %v3768_v8 }
 0x11d   : > { %3520 = vmatprep.mubr.bf16.mxu0 %v3769_v9 }
 0x124   : > { %3521 = vmatmul.mubr.bf16.gmra.mxu0 %v3770_v10 }
 0x1cc   : > { %v3510_v15 = vpop.f32.mrf.mxu0 }
 0x1cd   : > { %v932_v17 = vadd.f32 %v3510_v15, %v755_v14 }
 0x1ce   : > { %v867_v18 = vpop.f32.mrf.mxu0 }
 0x1cf   : > { %949 = vst.msk [vmem:[#allocation3 + $0x10] sm:$0xff] %vm710_vm2, %v932_v17  ;;  %v930_v20 = vadd.f32 %v867_v18, %v753_v16  ;;  %v766_v16 = vld [vmem:[#allocation3 + $0x68] sm:$0xff] }
 0x1d0   : > { %v3511_v21 = vpop.f32.mrf.mxu0 }
 0x1d1   : > { %947 = vst.msk [vmem:[#allocation3] sm:$0xff] %vm710_vm2, %v930_v20  ;;  %v933_v23 = vadd.f32 %v3511_v21, %v756_v19 }
 0x1d2   : > { %v870_v24 = vpop.f32.mrf.mxu0 }
 0x1d3   : > { %950 = vst.msk [vmem:[#allocation3 + $0x18] sm:$0xff] %vm710_vm2, %v933_v23  ;;  %v931_v26 = vadd.f32 %v870_v24, %v754_v22 }
 0x1d4   : > { %v3514_v27 = vpop.f32.mrf.mxu0 }
 0x1d5   : > { %948 = vst.msk [vmem:[#allocation3 + $0x8] sm:$0xff] %vm710_vm2, %v931_v26  ;;  %v936_v29 = vadd.f32 %v3514_v27, %v759_v25 }
 0x1d6   : > { %v883_v30 = vpop.f32.mrf.mxu0  ;;  %v984_v49 = vld [vmem:[#allocation3 + $0x10] sm:$0xff] }
 0x1d7   : > { %953 = vst.msk [vmem:[#allocation3 + $0x30] sm:$0xff] %vm710_vm2, %v936_v29  ;;  %v934_v32 = vadd.f32 %v883_v30, %v757_v28 }
 0x1d8   : > { %v3515_v33 = vpop.f32.mrf.mxu0  ;;  %v982_v42 = vld [vmem:[#allocation3] sm:$0xff] }
 0x1d9   : > { %951 = vst.msk [vmem:[#allocation3 + $0x20] sm:$0xff] %vm710_vm2, %v934_v32  ;;  %v937_v35 = vadd.f32 %v3515_v33, %v760_v31 }
 0x1da   : > { %v886_v36 = vpop.f32.mrf.mxu0  ;;  %v985_v39 = vld [vmem:[#allocation3 + $0x18] sm:$0xff] }
 0x1db   : > { %954 = vst.msk [vmem:[#allocation3 + $0x38] sm:$0xff] %vm710_vm2, %v937_v35  ;;  %v935_v38 = vadd.f32 %v886_v36, %v758_v34  ;;  %v1018_v53 = vpack.c.bf16 %v985_v39, %v984_v49 }
 0x1dc   : > { %v3518_v40 = vpop.f32.mrf.mxu0  ;;  %v983_v43 = vld [vmem:[#allocation3 + $0x8] sm:$0xff] }
 0x1dd   : > { %952 = vst.msk [vmem:[#allocation3 + $0x28] sm:$0xff] %vm710_vm2, %v935_v38  ;;  %v940_v44 = vadd.f32 %v3518_v40, %v763_v37  ;;  %v1017_v46 = vpack.c.bf16 %v983_v43, %v982_v42 }
 0x1de   : > { %v899_v50 = vpop.f32.mrf.mxu0  ;;  %v988_v10 = vld [vmem:[#allocation3 + $0x30] sm:$0xff] }
 0x1df   : > { %957 = vst.msk [vmem:[#allocation3 + $0x50] sm:$0xff] %vm710_vm2, %v940_v44  ;;  %v938_v56 = vadd.f32 %v899_v50, %v761_v41  ;;  %3528 = vmatprep.mubr.msk.bf16.mxu1 %vm710_vm2, %v1017_v46  ;;  %v4273_v50 = vld [vmem:[%s4270_s23 + $0x1] ss:$0 sm:$0xff] }
 0x1e0   : > { %v3519_v57 = vpop.f32.mrf.mxu0  ;;  %3529 = vmatmul.mubr.msk.bf16.vlgmr.msra.gmra.mxu1 %vm710_vm2, %v1018_v53  ;;  %v986_v6 = vld [vmem:[#allocation3 + $0x20] sm:$0xff] }
 0x1e1   : > { %955 = vst.msk [vmem:[#allocation3 + $0x40] sm:$0xff] %vm710_vm2, %v938_v56  ;;  %v941_v60 = vadd.f32 %v3519_v57, %v764_v51  ;;  %3545 = vmatpush3.bf16.msra.mxu1 %v3773_v13 }
 0x1e2   : > { %v902_v62 = vpop.f32.mrf.mxu0  ;;  %3546 = vmatprep.subr.bf16.mxu1 %v3774_v54  ;;  %v989_v2 = vld [vmem:[#allocation3 + $0x38] sm:$0xff] }
 0x1e3   : > { %958 = vst.msk [vmem:[#allocation3 + $0x58] sm:$0xff] %vm710_vm2, %v941_v60  ;;  %v939_v1 = vadd.f32 %v902_v62, %v762_v59  ;;  %v1020_v13 = vpack.c.bf16 %v989_v2, %v988_v10 }
 0x1e4   : > { %v3522_v4 = vpop.f32.mrf.mxu0  ;;  %v987_v7 = vld [vmem:[#allocation3 + $0x28] sm:$0xff] }
 0x1e5   : > { %956 = vst.msk [vmem:[#allocation3 + $0x48] sm:$0xff] %vm710_vm2, %v939_v1  ;;  %v944_v8 = vadd.f32 %v3522_v4, %v767_v63  ;;  %v1019_v9 = vpack.c.bf16 %v987_v7, %v986_v6  ;;  %3547 = vmatpush3.bf16.msra.mxu1 %v3774_v54 }
 0x1e6   : > { %v915_v11 = vpop.f32.mrf.mxu0  ;;  %v992_v24 = vld [vmem:[#allocation3 + $0x50] sm:$0xff] }
 0x1e7   : > { %961 = vst.msk [vmem:[#allocation3 + $0x70] sm:$0xff] %vm710_vm2, %v944_v8  ;;  %v942_v14 = vadd.f32 %v915_v11, %v765_v5  ;;  %3532 = vmatprep.mubr.msk.bf16.mxu1 %vm710_vm2, %v1019_v9 }
 0x1e8   : > { %v3523_v15 = vpop.f32.mrf.mxu0  ;;  %3533 = vmatmul.mubr.msk.bf16.gmra.mxu1 %vm710_vm2, %v1020_v13  ;;  %v990_v21 = vld [vmem:[#allocation3 + $0x40] sm:$0xff] }
 0x1e9   : > { %959 = vst.msk [vmem:[#allocation3 + $0x60] sm:$0xff] %vm710_vm2, %v942_v14  ;;  %v945_v17 = vadd.f32 %v3523_v15, %v768_v12 }
 0x1ea   : > { %v918_v18 = vpop.f32.mrf.mxu0  ;;  %v993_v20 = vld [vmem:[#allocation3 + $0x58] sm:$0xff] }
 0x1eb   : > { %962 = vst.msk [vmem:[#allocation3 + $0x78] sm:$0xff] %vm710_vm2, %v945_v17  ;;  %v943_v19 = vadd.f32 %v918_v18, %v766_v16  ;;  %v1022_v25 = vpack.c.bf16 %v993_v20, %v992_v24 }
 0x1ec   : > { %v991_v22 = vld [vmem:[#allocation3 + $0x48] sm:$0xff] }
 0x1ed   : > { %960 = vst.msk [vmem:[#allocation3 + $0x68] sm:$0xff] %vm710_vm2, %v943_v19  ;;  %v1021_v23 = vpack.c.bf16 %v991_v22, %v990_v21 }
 0x1ee   : > { %v996_v30 = vld [vmem:[#allocation3 + $0x70] sm:$0xff] }
 0x1ef   : > { %3536 = vmatprep.mubr.msk.bf16.mxu1 %vm710_vm2, %v1021_v23 }
 0x1f0   : > { %3537 = vmatmul.mubr.msk.bf16.gmra.mxu1 %vm710_vm2, %v1022_v25  ;;  %v994_v27 = vld [vmem:[#allocation3 + $0x60] sm:$0xff] }
 0x1f2   : > { %v997_v26 = vld [vmem:[#allocation3 + $0x78] sm:$0xff] }
 0x1f3   : > { %v1024_v31 = vpack.c.bf16 %v997_v26, %v996_v30 }
 0x1f4   : > { %v995_v28 = vld [vmem:[#allocation3 + $0x68] sm:$0xff] }
 0x1f5   : > { %v1023_v29 = vpack.c.bf16 %v995_v28, %v994_v27 }
 0x1f7   : > { %3540 = vmatprep.mubr.msk.bf16.mxu1 %vm710_vm2, %v1023_v29 }
 0x1f8   : > { %3541 = vmatmul.mubr.msk.bf16.gmra.mxu1 %vm710_vm2, %v1024_v31 }
 0x1f9   : > { %3548 = vmatprep.mubr.msk.bf16.mxu1 %vm710_vm2, %v4169_v3 }
 0x200   : > { %3549 = vmatmul.mubr.msk.bf16.vlgmr.msra.gmra.mxu1 %vm710_vm2, %v4165_v0 }
 0x201   : > { %3552 = vmatprep.mubr.msk.bf16.mxu1 %vm710_vm2, %v4161_v61  ;;  %v3775_v61 = vld [vmem:[%s1343_s29 + $0x8] sm:$0xff]  }
 0x202   : > { %3564 = vmatprep.subr.bf16.mxu0 %v3775_v61  ;;  %3710 = vmatprep.subr.bf16.mxu1 %v3775_v61 }
 0x203   : > { %3565 = vmatpush3.bf16.msra.mxu0 %v3775_v61  ;;  %3712 = vmatpush3.bf16.msra.mxu1 %v3775_v61 }
 0x208   : > { %3553 = vmatmul.mubr.msk.bf16.gmra.mxu1 %vm710_vm2, %v4157_v58 }
 0x209   : > { %3556 = vmatprep.mubr.msk.bf16.mxu1 %vm710_vm2, %v4153_v55  ;;  %v3776_v55 = vld [vmem:[%s1343_s29] sm:$0xff]   ;;  %s1507_s29 = scalar_lea.vmem %s4957_s7, %s3296_s24 }
 0x20a   : > { %3566 = vmatprep.subr.bf16.mxu0 %v3776_v55  ;;  %3711 = vmatprep.subr.bf16.mxu1 %v3776_v55 }
 0x20b   : > { %3567 = vmatpush3.bf16.msra.mxu0 %v3776_v55  ;;  %3713 = vmatpush3.bf16.msra.mxu1 %v3776_v55 }
 0x210   : > { %3557 = vmatmul.mubr.msk.bf16.gmra.mxu1 %vm710_vm2, %v4146_v52 }
 0x211   : > { %3560 = vmatprep.mubr.msk.bf16.mxu1 %vm710_vm2, %v4141_v48 }
 0x218   : > { %3561 = vmatmul.mubr.msk.bf16.gmra.mxu1 %vm710_vm2, %v4107_v45 }
 0x2a0   : > { %v3530_v48 = vpop.f32.mrf.mxu1 }
 0x2a2   : > { %v1095_v52 = vpop.f32.mrf.mxu1 }
 0x2a4   : > { %v3531_v45 = vpop.f32.mrf.mxu1 }
 0x2a6   : > { %v1098_v58 = vpop.f32.mrf.mxu1 }
 0x2a8   : > { %v3534_v0 = vpop.f32.mrf.mxu1 }
 0x2aa   : > { %v1111_v3 = vpop.f32.mrf.mxu1 }
 0x2ac   : > { %v3535_v32 = vpop.f32.mrf.mxu1 }
 0x2ae   : > { %v1114_v33 = vpop.f32.mrf.mxu1 }
 0x2b0   : > { %v3538_v34 = vpop.f32.mrf.mxu1 }
 0x2b2   : > { %v1127_v35 = vpop.f32.mrf.mxu1 }
 0x2b4   : > { %v3539_v36 = vpop.f32.mrf.mxu1 }
 0x2b6   : > { %v1130_v37 = vpop.f32.mrf.mxu1 }
 0x2b8   : > { %v4256_v38 = vpop.f32.mrf.mxu1 }
 0x2ba   : > { %v4258_v39 = vpop.f32.mrf.mxu1 }
 0x2bc   : > { %v4260_v40 = vpop.f32.mrf.mxu1 }
 0x2be   : > { %v4262_v41 = vpop.f32.mrf.mxu1 }
 0x2c0   : > { %v3550_v42 = vpop.f32.mrf.mxu1 }
 0x2c1   : > { %v1237_v46 = vadd.f32 %v3550_v42, %v3530_v48 }
 0x2c2   : > { %v1228_v43 = vpop.f32.mrf.mxu1 }
 0x2c3   : > { %v1229_v44 = vadd.f32 %v1228_v43, %v1095_v52  ;;  %v1303_v59 = vadd.f32 %v4273_v50, %v1237_v46 }
 0x2c4   : > { %v3551_v49 = vpop.f32.mrf.mxu1 }
 0x2c5   : > { %v1240_v51 = vadd.f32 %v3551_v49, %v3531_v45  ;;  %v1301_v54 = vadd.f32 %v4273_v50, %v1229_v44  ;;  %v1319_v6 = vmax.f32 %v1303_v59, 0.0 }
 0x2c6   : > { %v1231_v53 = vpop.f32.mrf.mxu1 }
 0x2c7   : > { %v1304_v56 = vadd.f32 %v4273_v50, %v1240_v51  ;;  %v1232_v57 = vadd.f32 %v1231_v53, %v1098_v58  ;;  %v1317_v2 = vmax.f32 %v1301_v54, 0.0 }
 0x2c8   : > { %v3554_v60 = vpop.f32.mrf.mxu1 }
 0x2c9   : > { %v1302_v62 = vadd.f32 %v4273_v50, %v1232_v57  ;;  %v1320_v63 = vmax.f32 %v1304_v56, 0.0  ;;  %v1253_v7 = vadd.f32 %v3554_v60, %v3534_v0 }
 0x2ca   : > { %v1244_v1 = vpop.f32.mrf.mxu1 }
 0x2cb   : > { %v1318_v4 = vmax.f32 %v1302_v62, 0.0  ;;  %v1245_v5 = vadd.f32 %v1244_v1, %v1111_v3  ;;  %v1334_v11 = vpack.c.bf16 %v1320_v63, %v1319_v6  ;;  %v1307_v16 = vadd.f32 %v4273_v50, %v1253_v7  ;;  %v3285_v63 = vld [vmem:[%s4270_s23 + $0x2] ss:$0 sm:$0xff]  ;;  %s1991_s23 = scalar_lea.vmem %s4958_s8, %s3357_s26 }
 0x2cc   : > { %v3555_v8 = vpop.f32.mrf.mxu1 }
 0x2cd   : > { %v1333_v9 = vpack.c.bf16 %v1318_v4, %v1317_v2  ;;  %v1256_v10 = vadd.f32 %v3555_v8, %v3535_v32  ;;  %v1305_v13 = vadd.f32 %v4273_v50, %v1245_v5  ;;  %v1323_v24 = vmax.f32 %v1307_v16, 0.0 }
 0x2ce   : > { %v1247_v12 = vpop.f32.mrf.mxu1 }
 0x2cf   : > { %v1308_v14 = vadd.f32 %v4273_v50, %v1256_v10  ;;  %v1248_v15 = vadd.f32 %v1247_v12, %v1114_v33  ;;  %3568 = vmatprep.mubr.msk.bf16.mxu0 %vm710_vm2, %v1333_v9  ;;  %v1321_v21 = vmax.f32 %v1305_v13, 0.0 }
 0x2d0   : > { %v3558_v17 = vpop.f32.mrf.mxu1  ;;  %3569 = vmatmul.mubr.msk.bf16.vlgmr.msra.gmra.mxu0 %vm710_vm2, %v1334_v11 }
 0x2d1   : > { %v1306_v18 = vadd.f32 %v4273_v50, %v1248_v15  ;;  %v1324_v19 = vmax.f32 %v1308_v14, 0.0  ;;  %v1269_v25 = vadd.f32 %v3558_v17, %v3538_v34 }
 0x2d2   : > { %v1260_v20 = vpop.f32.mrf.mxu1 }
 0x2d3   : > { %v1322_v22 = vmax.f32 %v1306_v18, 0.0  ;;  %v1261_v23 = vadd.f32 %v1260_v20, %v1127_v35  ;;  %v1336_v29 = vpack.c.bf16 %v1324_v19, %v1323_v24  ;;  %v1311_v48 = vadd.f32 %v4273_v50, %v1269_v25 }
 0x2d4   : > { %v3559_v26 = vpop.f32.mrf.mxu1 }
 0x2d5   : > { %v1335_v27 = vpack.c.bf16 %v1322_v22, %v1321_v21  ;;  %v1272_v28 = vadd.f32 %v3559_v26, %v3539_v36  ;;  %v1309_v31 = vadd.f32 %v4273_v50, %v1261_v23  ;;  %v1327_v34 = vmax.f32 %v1311_v48, 0.0 }
 0x2d6   : > { %v1263_v30 = vpop.f32.mrf.mxu1 }
 0x2d7   : > { %v1312_v61 = vadd.f32 %v4273_v50, %v1272_v28  ;;  %v1264_v55 = vadd.f32 %v1263_v30, %v1130_v37  ;;  %3572 = vmatprep.mubr.msk.bf16.mxu0 %vm710_vm2, %v1335_v27  ;;  %v1325_v3 = vmax.f32 %v1309_v31, 0.0 }
 0x2d8   : > { %v3562_v52 = vpop.f32.mrf.mxu1  ;;  %3573 = vmatmul.mubr.msk.bf16.gmra.mxu0 %vm710_vm2, %v1336_v29 }
 0x2d9   : > { %v1310_v45 = vadd.f32 %v4273_v50, %v1264_v55  ;;  %v1328_v58 = vmax.f32 %v1312_v61, 0.0  ;;  %v1285_v35 = vadd.f32 %v3562_v52, %v4256_v38 }
 0x2da   : > { %v1276_v0 = vpop.f32.mrf.mxu1 }
 0x2db   : > { %v1326_v32 = vmax.f32 %v1310_v45, 0.0  ;;  %v1277_v33 = vadd.f32 %v1276_v0, %v4258_v39  ;;  %v1338_v43 = vpack.c.bf16 %v1328_v58, %v1327_v34  ;;  %v1315_v39 = vadd.f32 %v4273_v50, %v1285_v35 }
 0x2dc   : > { %v3563_v36 = vpop.f32.mrf.mxu1 }
 0x2dd   : > { %v1337_v37 = vpack.c.bf16 %v1326_v32, %v1325_v3  ;;  %v1288_v42 = vadd.f32 %v3563_v36, %v4260_v40  ;;  %v1313_v46 = vadd.f32 %v4273_v50, %v1277_v33  ;;  %v1331_v56 = vmax.f32 %v1315_v39, 0.0 }
 0x2de   : > { %v1279_v44 = vpop.f32.mrf.mxu1 }
 0x2df   : > { %v1316_v49 = vadd.f32 %v4273_v50, %v1288_v42  ;;  %v1280_v51 = vadd.f32 %v1279_v44, %v4262_v41  ;;  %3576 = vmatprep.mubr.msk.bf16.mxu0 %vm710_vm2, %v1337_v37  ;;  %v1329_v40 = vmax.f32 %v1313_v46, 0.0  ;;  %v4307_v41 = vld [vmem:[%s1507_s29] sm:$0xf]  ;;  %s2171_s29 = scalar_lea.vmem %s4963_s13, %s3935_s18 }
 0x2e0   : > { %3577 = vmatmul.mubr.msk.bf16.gmra.mxu0 %vm710_vm2, %v1338_v43  ;;  %3714 = vmatprep.subr.msk.bf16.mxu1 %vm710_vm2, %v4307_v41 }
 0x2e1   : > { %v1314_v38 = vadd.f32 %v4273_v50, %v1280_v51  ;;  %v1332_v53 = vmax.f32 %v1316_v49, 0.0  ;;  %v1542_v50 = vsel %vm710_vm2, %v4307_v41, 0  ;;  %3715 = vmatprep.subr.msk.bf16.mxu0 %vm1850_vm4, %v4307_v41 }
 0x2e3   : > { %v1330_v54 = vmax.f32 %v1314_v38, 0.0  ;;  %v1340_v59 = vpack.c.bf16 %v1332_v53, %v1331_v56 }
 0x2e5   : > { %v1339_v57 = vpack.c.bf16 %v1330_v54, %v1329_v40 }
 0x2e7   : > { %3580 = vmatprep.mubr.msk.bf16.mxu1 %vm710_vm2, %v1339_v57 }
 0x2e8   : > { %3581 = vmatmul.mubr.msk.bf16.vlgmr.msra.gmra.mxu1 %vm710_vm2, %v1340_v59 }
 0x2e9   : > { %3585 = vmatpush3.bf16.xpose.msra.mxu1 %v1542_v50 }
 0x390   : > { %v3570_v60 = vpop.f32.mrf.mxu0 }
 0x391   : > { %v1436_v5 = vadd.f32 %v3570_v60, %v3285_v63 }
 0x392   : > { %v1427_v62 = vpop.f32.mrf.mxu0 }
 0x393   : > { %v1428_v2 = vadd.f32 %v3285_v63, %v1427_v62  ;;  %v1492_v12 = vmax.f32 %v1436_v5, 0.0 }
 0x394   : > { %v3571_v1 = vpop.f32.mrf.mxu0 }
 0x395   : > { %v1439_v4 = vadd.f32 %v3571_v1, %v3285_v63  ;;  %v1490_v10 = vmax.f32 %v1428_v2, 0.0 }
 0x396   : > { %v1430_v6 = vpop.f32.mrf.mxu0 }
 0x397   : > { %v1431_v7 = vadd.f32 %v3285_v63, %v1430_v6  ;;  %v1493_v8 = vmax.f32 %v1439_v4, 0.0 }
 0x398   : > { %v3574_v9 = vpop.f32.mrf.mxu0 }
 0x399   : > { %v1491_v11 = vmax.f32 %v1431_v7, 0.0  ;;  %v1510_v15 = vpack.c.bf16 %v1493_v8, %v1492_v12  ;;  %v1452_v19 = vadd.f32 %v3574_v9, %v3285_v63 }
 0x39a   : > { %v1443_v13 = vpop.f32.mrf.mxu0 }
 0x39b   : > { %v1509_v14 = vpack.c.bf16 %v1491_v11, %v1490_v10  ;;  %v1444_v17 = vadd.f32 %v3285_v63, %v1443_v13  ;;  %v1496_v26 = vmax.f32 %v1452_v19, 0.0 }
 0x39c   : > { %v3575_v16 = vpop.f32.mrf.mxu0 }
 0x39d   : > { %v1455_v18 = vadd.f32 %v3575_v16, %v3285_v63  ;;  %3586 = vmatprep.mubr.msk.bf16.mxu1 %vm710_vm2, %v1509_v14  ;;  %v1494_v24 = vmax.f32 %v1444_v17, 0.0 }
 0x39e   : > { %v1446_v20 = vpop.f32.mrf.mxu0  ;;  %3587 = vmatmul.mubr.msk.bf16.vlgmr.msra.gmra.mxu1 %vm710_vm2, %v1510_v15 }
 0x39f   : > { %v1447_v21 = vadd.f32 %v3285_v63, %v1446_v20  ;;  %v1497_v22 = vmax.f32 %v1455_v18, 0.0 }
 0x3a0   : > { %v3578_v23 = vpop.f32.mrf.mxu0 }
 0x3a1   : > { %v1495_v25 = vmax.f32 %v1447_v21, 0.0  ;;  %v1512_v29 = vpack.c.bf16 %v1497_v22, %v1496_v26  ;;  %v1468_v55 = vadd.f32 %v3578_v23, %v3285_v63 }
 0x3a2   : > { %v1459_v27 = vpop.f32.mrf.mxu0 }
 0x3a3   : > { %v1511_v28 = vpack.c.bf16 %v1495_v25, %v1494_v24  ;;  %v1460_v31 = vadd.f32 %v3285_v63, %v1459_v27  ;;  %v1500_v32 = vmax.f32 %v1468_v55, 0.0 }
 0x3a4   : > { %v3579_v30 = vpop.f32.mrf.mxu0 }
 0x3a5   : > { %v1471_v61 = vadd.f32 %v3579_v30, %v3285_v63  ;;  %3590 = vmatprep.mubr.msk.bf16.mxu1 %vm710_vm2, %v1511_v28  ;;  %v1498_v0 = vmax.f32 %v1460_v31, 0.0 }
 0x3a6   : > { %v1462_v48 = vpop.f32.mrf.mxu0  ;;  %3591 = vmatmul.mubr.msk.bf16.gmra.mxu1 %vm710_vm2, %v1512_v29 }
 0x3a7   : > { %v1463_v52 = vadd.f32 %v3285_v63, %v1462_v48  ;;  %v1501_v45 = vmax.f32 %v1471_v61, 0.0 }
 0x3a8   : > { %v3582_v58 = vpop.f32.mrf.mxu1 }
 0x3a9   : > { %v1499_v3 = vmax.f32 %v1463_v52, 0.0  ;;  %v1514_v35 = vpack.c.bf16 %v1501_v45, %v1500_v32  ;;  %v1484_v43 = vadd.f32 %v3582_v58, %v3285_v63 }
 0x3aa   : > { %v1475_v33 = vpop.f32.mrf.mxu1 }
 0x3ab   : > { %v1513_v34 = vpack.c.bf16 %v1499_v3, %v1498_v0  ;;  %v1476_v37 = vadd.f32 %v3285_v63, %v1475_v33  ;;  %v1504_v38 = vmax.f32 %v1484_v43, 0.0 }
 0x3ac   : > { %v3583_v36 = vpop.f32.mrf.mxu1 }
 0x3ad   : > { %v1487_v42 = vadd.f32 %v3583_v36, %v3285_v63  ;;  %3594 = vmatprep.mubr.msk.bf16.mxu1 %vm710_vm2, %v1513_v34  ;;  %v1502_v51 = vmax.f32 %v1476_v37, 0.0 }
 0x3ae   : > { %v1478_v44 = vpop.f32.mrf.mxu1  ;;  %3595 = vmatmul.mubr.msk.bf16.gmra.mxu1 %vm710_vm2, %v1514_v35 }
 0x3af   : > { %v1479_v46 = vadd.f32 %v3285_v63, %v1478_v44  ;;  %v1505_v49 = vmax.f32 %v1487_v42, 0.0 }
 0x3b1   : > { %v1503_v39 = vmax.f32 %v1479_v46, 0.0  ;;  %v1516_v40 = vpack.c.bf16 %v1505_v49, %v1504_v38 }
 0x3b3   : > { %v1515_v53 = vpack.c.bf16 %v1503_v39, %v1502_v51 }
 0x3b5   : > { %3598 = vmatprep.mubr.msk.bf16.mxu1 %vm710_vm2, %v1515_v53 }
 0x3b6   : > { %3599 = vmatmul.mubr.msk.bf16.gmra.mxu1 %vm710_vm2, %v1516_v40 }
 0x45e   : > { %v3588_v54 = vpop.f32.mrf.mxu1 }
 0x45f   : > { %v1648_v56 = vsel %vm1641_vm3, %v3588_v54, -inf }
 0x460   : > { %1649 = vmax.xlane.f32.xlu1 %v1648_v56  ;;  %v1578_v57 = vpop.f32.mrf.mxu1 }
 0x461   : > { %v1642_v59 = vsel %vm1641_vm3, %v1578_v57, -inf }
 0x462   : > { %1643 = vmax.xlane.f32.xlu0 %v1642_v59  ;;  %v3589_v50 = vpop.f32.mrf.mxu1 }
 0x463   : > { %v1651_v60 = vsel %vm1641_vm3, %v3589_v50, -inf }
 0x464   : > { %1652 = vmax.xlane.f32.xlu1 %v1651_v60  ;;  %v1581_v62 = vpop.f32.mrf.mxu1 }
 0x465   : > { %v1645_v63 = vsel %vm1641_vm3, %v1581_v62, -inf }
 0x466   : > { %1646 = vmax.xlane.f32.xlu0 %v1645_v63  ;;  %v3592_v1 = vpop.f32.mrf.mxu1 }
 0x467   : > { %v1660_v7 = vsel %vm1641_vm3, %v3592_v1, -inf }
 0x468   : > { %v1594_v2 = vpop.f32.mrf.mxu1 }
 0x469   : > { %v1654_v4 = vsel %vm1641_vm3, %v1594_v2, -inf }
 0x46a   : > { %1655 = vmax.xlane.f32.xlu0 %v1654_v4  ;;  %v4327_v5 = vpop.f32.mrf.mxu1 }
 0x46b   : > { %v1663_v11 = vsel %vm1641_vm3, %v4327_v5, -inf }
 0x46c   : > { %v1597_v6 = vpop.f32.mrf.mxu1 }
 0x46d   : > { %v1657_v8 = vsel %vm1641_vm3, %v1597_v6, -inf }
 0x46e   : > { %1661 = vmax.xlane.f32.xlu0 %v1660_v7  ;;  %1658 = vmax.xlane.f32.xlu1 %v1657_v8  ;;  %v4331_v9 = vpop.f32.mrf.mxu1 }
 0x46f   : > { %v1672_v15 = vsel %vm1641_vm3, %v4331_v9, -inf }
 0x470   : > { %v1610_v10 = vpop.f32.mrf.mxu1 }
 0x471   : > { %v1666_v12 = vsel %vm1641_vm3, %v1610_v10, -inf }
 0x472   : > { %1664 = vmax.xlane.f32.xlu1 %v1663_v11  ;;  %1667 = vmax.xlane.f32.xlu0 %v1666_v12  ;;  %v4336_v13 = vpop.f32.mrf.mxu1 }
 0x473   : > { %v1675_v19 = vsel %vm1641_vm3, %v4336_v13, -inf }
 0x474   : > { %v4338_v14 = vpop.f32.mrf.mxu1 }
 0x475   : > { %v1669_v16 = vsel %vm1641_vm3, %v4338_v14, -inf }
 0x476   : > { %1673 = vmax.xlane.f32.xlu0 %v1672_v15  ;;  %1670 = vmax.xlane.f32.xlu1 %v1669_v16  ;;  %v4344_v17 = vpop.f32.mrf.mxu1 }
 0x477   : > { %v1684_v23 = vsel %vm1641_vm3, %v4344_v17, -inf }
 0x478   : > { %v4346_v18 = vpop.f32.mrf.mxu1 }
 0x479   : > { %v1678_v20 = vsel %vm1641_vm3, %v4346_v18, -inf }
 0x47a   : > { %1676 = vmax.xlane.f32.xlu1 %v1675_v19  ;;  %1679 = vmax.xlane.f32.xlu0 %v1678_v20  ;;  %v4352_v21 = vpop.f32.mrf.mxu1 }
 0x47b   : > { %v1687_v25 = vsel %vm1641_vm3, %v4352_v21, -inf }
 0x47c   : > { %v4354_v22 = vpop.f32.mrf.mxu1 }
 0x47d   : > { %v1681_v24 = vsel %vm1641_vm3, %v4354_v22, -inf }
 0x47e   : > { %1685 = vmax.xlane.f32.xlu0 %v1684_v23  ;;  %1682 = vmax.xlane.f32.xlu1 %v1681_v24 }
 0x482   : > { %1688 = vmax.xlane.f32.xlu1 %v1687_v25  ;;  %v1851_v25 = vsel %vm1850_vm4, %v4307_v41, 0 }
 0x483   : > { %3603 = vmatpush3.bf16.msra.mxu0 %v1851_v25 }
 0x4e9   : > { %v1650_v26 = vpop.xlane.xlu1 %1649 }
 0x4ea   : > { %v1692_v27 = vsub.f32 %v3588_v54, %v1650_v26 }
 0x4eb   : > { %v1644_v28 = vpop.xlane.xlu0 %1643 }
 0x4ec   : > { %v1690_v29 = vsub.f32 %v1578_v57, %v1644_v28  ;;  %v1710_v31 = vmul.f32 1.442695, %v1692_v27 }
 0x4ed   : > { %v1653_v30 = vpop.xlane.xlu1 %1652 }
 0x4ee   : > { %v1706_v61 = vmul.f32 1.442695, %v1690_v29  ;;  %v1693_v55 = vsub.f32 %v3589_v50, %v1653_v30 }
 0x4ef   : > { %v1647_v48 = vpop.xlane.xlu0 %1646 }
 0x4f0   : > { %3783 = vpow2.f32 %v1706_v61  ;;  %v1691_v52 = vsub.f32 %v1581_v62, %v1647_v48  ;;  %v1712_v45 = vmul.f32 1.442695, %v1693_v55 }
 0x4f1   : > { %3785 = vpow2.f32 %v1710_v31 }
 0x4f2   : > { %v1708_v58 = vmul.f32 1.442695, %v1691_v52 }
 0x4f3   : > { %v1656_v0 = vpop.xlane.xlu0 %1655 }
 0x4f4   : > { %3787 = vpow2.f32 %v1708_v58  ;;  %v1694_v3 = vsub.f32 %v1594_v2, %v1656_v0 }
 0x4f5   : > { %3789 = vpow2.f32 %v1712_v45 }
 0x4f6   : > { %v1714_v32 = vmul.f32 1.442695, %v1694_v3 }
 0x4f7   : > { %v1662_v33 = vpop.xlane.xlu0 %1661  ;;  %v1659_v34 = vpop.xlane.xlu1 %1658 }
 0x4f8   : > { %3791 = vpow2.f32 %v1714_v32  ;;  %v1696_v35 = vsub.f32 %v3592_v1, %v1662_v33  ;;  %v1695_v36 = vsub.f32 %v1597_v6, %v1659_v34 }
 0x4fa   : > { %v1718_v37 = vmul.f32 1.442695, %v1696_v35  ;;  %v1716_v42 = vmul.f32 1.442695, %v1695_v36  ;;  %v3777_v36 = vld [vmem:[%s1991_s23 + $0x8] sm:$0xff]  }
 0x4fb   : > { %v1665_v43 = vpop.xlane.xlu1 %1664  ;;  %v1668_v44 = vpop.xlane.xlu0 %1667  ;;  %3620 = vmatprep.subr.bf16.mxu1 %v3777_v36 }
 0x4fc   : > { %3793 = vpow2.f32 %v1718_v37  ;;  %v1697_v46 = vsub.f32 %v4327_v5, %v1665_v43  ;;  %v1698_v49 = vsub.f32 %v1610_v10, %v1668_v44  ;;  %v3778_v37 = vld [vmem:[%s1991_s23] sm:$0xff]   ;;  %3621 = vmatpush3.bf16.msra.mxu1 %v3777_v36  ;;  %v3780_v36 = vld [vmem:[%s4206_s25 + $0x10] sm:$0xff]  }
 0x4fd   : > { %v4363_v51 = vpop.eup %3783  ;;  %3795 = vpow2.f32 %v1716_v42  ;;  %3622 = vmatprep.subr.bf16.mxu1 %v3778_v37 }
 0x4fe   : > { %v1720_v39 = vmul.f32 1.442695, %v1697_v46  ;;  %v1722_v38 = vmul.f32 1.442695, %v1698_v49  ;;  %v1738_v53 = vsel %vm1641_vm3, %v4363_v51, 0.0  ;;  %v4367_v40 = vpop.eup %3785 }
 0x4ff   : > { %v1674_v54 = vpop.xlane.xlu0 %1673  ;;  %v1671_v56 = vpop.xlane.xlu1 %1670  ;;  %1739 = vadd.xlane.f32.xlu0 %v1738_v53  ;;  %v1744_v63 = vsel %vm1641_vm3, %v4367_v40, 0.0 }
 0x500   : > { %3797 = vpow2.f32 %v1720_v39  ;;  %v1700_v57 = vsub.f32 %v4331_v9, %v1674_v54  ;;  %v1699_v59 = vsub.f32 %v4338_v14, %v1671_v56  ;;  %3623 = vmatpush3.bf16.msra.mxu1 %v3778_v37  ;;  %v3781_v37 = vld [vmem:[%s4206_s25 + $0x8] sm:$0xff]  }
 0x501   : > { %v4371_v50 = vpop.eup %3787  ;;  %3799 = vpow2.f32 %v1722_v38  ;;  %3664 = vmatprep.subr.bf16.mxu1 %v4966_v47 }
 0x502   : > { %v1726_v60 = vmul.f32 1.442695, %v1700_v57  ;;  %v1724_v62 = vmul.f32 1.442695, %v1699_v59  ;;  %v1741_v1 = vsel %vm1641_vm3, %v4371_v50, 0.0  ;;  %v4377_v2 = vpop.eup %3789 }
 0x503   : > { %v1677_v4 = vpop.xlane.xlu1 %1676  ;;  %1745 = vadd.xlane.f32.xlu0 %v1744_v63  ;;  %v1680_v5 = vpop.xlane.xlu0 %1679  ;;  %1742 = vadd.xlane.f32.xlu1 %v1741_v1  ;;  %v1747_v12 = vsel %vm1641_vm3, %v4377_v2, 0.0 }
 0x504   : > { %3801 = vpow2.f32 %v1726_v60  ;;  %v1701_v6 = vsub.f32 %v4336_v13, %v1677_v4  ;;  %v1702_v7 = vsub.f32 %v4346_v18, %v1680_v5 }
 0x505   : > { %v4381_v8 = vpop.eup %3791  ;;  %3803 = vpow2.f32 %v1724_v62 }
 0x506   : > { %v1728_v9 = vmul.f32 1.442695, %v1701_v6  ;;  %v1730_v10 = vmul.f32 1.442695, %v1702_v7  ;;  %v1750_v11 = vsel %vm1641_vm3, %v4381_v8, 0.0 }
 0x507   : > { %1751 = vadd.xlane.f32.xlu0 %v1750_v11  ;;  %v1686_v14 = vpop.xlane.xlu0 %1685  ;;  %1748 = vadd.xlane.f32.xlu1 %v1747_v12  ;;  %v1683_v15 = vpop.xlane.xlu1 %1682 }
 0x508   : > { %3805 = vpow2.f32 %v1728_v9  ;;  %v1704_v13 = vsub.f32 %v4344_v17, %v1686_v14  ;;  %v1703_v16 = vsub.f32 %v4354_v22, %v1683_v15 }
 0x509   : > { %v4389_v18 = vpop.eup %3793  ;;  %3807 = vpow2.f32 %v1730_v10 }
 0x50a   : > { %v4391_v19 = vpop.eup %3795  ;;  %v1734_v20 = vmul.f32 1.442695, %v1704_v13  ;;  %v1732_v23 = vmul.f32 1.442695, %v1703_v16  ;;  %v1756_v24 = vsel %vm1641_vm3, %v4389_v18, 0.0 }
 0x50b   : > { %1757 = vadd.xlane.f32.xlu0 %v1756_v24  ;;  %v1753_v17 = vsel %vm1641_vm3, %v4391_v19, 0.0  ;;  %v1689_v22 = vpop.xlane.xlu1 %1688 }
 0x50c   : > { %3809 = vpow2.f32 %v1734_v20  ;;  %1754 = vadd.xlane.f32.xlu1 %v1753_v17  ;;  %v1705_v26 = vsub.f32 %v4352_v21, %v1689_v22 }
 0x50d   : > { %v4400_v27 = vpop.eup %3797  ;;  %3811 = vpow2.f32 %v1732_v23 }
 0x50e   : > { %v4402_v28 = vpop.eup %3799  ;;  %v1736_v29 = vmul.f32 1.442695, %v1705_v26  ;;  %v1759_v30 = vsel %vm1641_vm3, %v4400_v27, 0.0 }
 0x50f   : > { %v1762_v41 = vsel %vm1641_vm3, %v4402_v28, 0.0 }
 0x510   : > { %3813 = vpow2.f32 %v1736_v29  ;;  %1763 = vadd.xlane.f32.xlu0 %v1762_v41  ;;  %1760 = vadd.xlane.f32.xlu1 %v1759_v30 }
 0x511   : > { %v4408_v31 = vpop.eup %3801 }
 0x512   : > { %v4410_v61 = vpop.eup %3803  ;;  %v1768_v21 = vsel %vm1641_vm3, %v4408_v31, 0.0 }
 0x513   : > { %v1765_v55 = vsel %vm1641_vm3, %v4410_v61, 0.0 }
 0x514   : > { %1769 = vadd.xlane.f32.xlu0 %v1768_v21  ;;  %1766 = vadd.xlane.f32.xlu1 %v1765_v55 }
 0x515   : > { %v4416_v48 = vpop.eup %3805 }
 0x516   : > { %v4418_v52 = vpop.eup %3807  ;;  %v1771_v45 = vsel %vm1641_vm3, %v4416_v48, 0.0 }
 0x517   : > { %v1774_v58 = vsel %vm1641_vm3, %v4418_v52, 0.0 }
 0x518   : > { %1775 = vadd.xlane.f32.xlu0 %v1774_v58  ;;  %1772 = vadd.xlane.f32.xlu1 %v1771_v45 }
 0x519   : > { %v4424_v0 = vpop.eup %3809 }
 0x51a   : > { %v4426_v3 = vpop.eup %3811  ;;  %v1780_v32 = vsel %vm1641_vm3, %v4424_v0, 0.0 }
 0x51b   : > { %v1777_v33 = vsel %vm1641_vm3, %v4426_v3, 0.0 }
 0x51c   : > { %1781 = vadd.xlane.f32.xlu0 %v1780_v32  ;;  %1778 = vadd.xlane.f32.xlu1 %v1777_v33 }
 0x51d   : > { %v4432_v34 = vpop.eup %3813 }
 0x51e   : > { %v1783_v35 = vsel %vm1641_vm3, %v4432_v34, 0.0 }
 0x520   : > { %1784 = vadd.xlane.f32.xlu1 %v1783_v35  ;;  %v3779_v35 = vld [vmem:[%s4206_s25 + $0x18] sm:$0xff]  }
 0x521   : > { %3640 = vmatprep.subr.bf16.mxu0 %v3779_v35 }
 0x588   : > { %v1740_v42 = vpop.xlane.xlu0 %1739 }
 0x589   : > { %3815 = vrcp.f32 %v1740_v42 }
 0x58c   : > { %v1746_v43 = vpop.xlane.xlu0 %1745  ;;  %v1743_v44 = vpop.xlane.xlu1 %1742 }
 0x58d   : > { %3817 = vrcp.f32 %v1743_v44 }
 0x58e   : > { %3819 = vrcp.f32 %v1746_v43 }
 0x590   : > { %v1752_v46 = vpop.xlane.xlu0 %1751  ;;  %v1749_v49 = vpop.xlane.xlu1 %1748 }
 0x591   : > { %3821 = vrcp.f32 %v1749_v49 }
 0x592   : > { %3823 = vrcp.f32 %v1752_v46 }
 0x594   : > { %v1758_v39 = vpop.xlane.xlu0 %1757 }
 0x595   : > { %v1755_v38 = vpop.xlane.xlu1 %1754 }
 0x596   : > { %3825 = vrcp.f32 %v1755_v38  ;;  %v3816_v53 = vpop.eup %3815 }
 0x597   : > { %3827 = vrcp.f32 %v1758_v39  ;;  %v1802_v59 = vmul.f32 %v3816_v53, %v4363_v51 }
 0x599   : > { %v1764_v54 = vpop.xlane.xlu0 %1763  ;;  %v1761_v56 = vpop.xlane.xlu1 %1760 }
 0x59a   : > { %v3818_v57 = vpop.eup %3817  ;;  %3829 = vrcp.f32 %v1761_v56 }
 0x59b   : > { %v1803_v60 = vmul.f32 %v3818_v57, %v4371_v50  ;;  %v3820_v62 = vpop.eup %3819  ;;  %3831 = vrcp.f32 %v1764_v54 }
 0x59c   : > { %v1804_v6 = vmul.f32 %v3820_v62, %v4367_v40 }
 0x59d   : > { %v1770_v63 = vpop.xlane.xlu0 %1769  ;;  %v1767_v1 = vpop.xlane.xlu1 %1766  ;;  %v1818_v4 = vpack.c.bf16 %v1803_v60, %v1802_v59 }
 0x59e   : > { %v3822_v5 = vpop.eup %3821  ;;  %3833 = vrcp.f32 %v1767_v1 }
 0x59f   : > { %v1805_v7 = vmul.f32 %v3822_v5, %v4377_v2  ;;  %3604 = vmatprep.mubr.msk.bf16.mxu0 %vm1641_vm3, %v1818_v4  ;;  %v3824_v9 = vpop.eup %3823  ;;  %3835 = vrcp.f32 %v1770_v63 }
 0x5a0   : > { %v1806_v50 = vmul.f32 %v3824_v9, %v4381_v8  ;;  %v3782_v9 = vld [vmem:[%s4206_s25] sm:$0xff]  }
 0x5a1   : > { %v1776_v10 = vpop.xlane.xlu0 %1775  ;;  %v1773_v11 = vpop.xlane.xlu1 %1772  ;;  %v1819_v51 = vpack.c.bf16 %v1805_v7, %v1804_v6 }
 0x5a2   : > { %3837 = vrcp.f32 %v1773_v11 }
 0x5a3   : > { %v3826_v12 = vpop.eup %3825  ;;  %3605 = vmatmul.mubr.msk.bf16.vlgmr.msra.gmra.mxu0 %vm1641_vm3, %v1819_v51  ;;  %3839 = vrcp.f32 %v1776_v10  ;;  %v3314_v51 = vld [vmem:[%s1996_s27] ss:$0 sm:$0xff] }
 0x5a4   : > { %v1807_v14 = vmul.f32 %v3826_v12, %v4391_v19  ;;  %v3828_v13 = vpop.eup %3827  ;;  %3641 = vmatpush3.bf16.msra.mxu0 %v3779_v35 }
 0x5a5   : > { %v1782_v15 = vpop.xlane.xlu0 %1781  ;;  %v1779_v40 = vpop.xlane.xlu1 %1778  ;;  %v1808_v23 = vmul.f32 %v3828_v13, %v4389_v18  ;;  %3642 = vmatprep.subr.bf16.mxu0 %v3780_v36 }
 0x5a6   : > { %v1820_v2 = vpack.c.bf16 %v1807_v14, %v1806_v50  ;;  %3841 = vrcp.f32 %v1779_v40 }
 0x5a7   : > { %v3830_v16 = vpop.eup %3829  ;;  %3843 = vrcp.f32 %v1782_v15 }
 0x5a8   : > { %3608 = vmatprep.mubr.msk.bf16.mxu0 %vm1641_vm3, %v1820_v2  ;;  %v1809_v24 = vmul.f32 %v3830_v16, %v4400_v27  ;;  %v3832_v25 = vpop.eup %3831  ;;  %3643 = vmatpush3.bf16.msra.mxu0 %v3780_v36 }
 0x5a9   : > { %v1785_v20 = vpop.xlane.xlu1 %1784  ;;  %v1810_v19 = vmul.f32 %v3832_v25, %v4402_v28  ;;  %3644 = vmatprep.subr.bf16.mxu0 %v3781_v37 }
 0x5aa   : > { %3845 = vrcp.f32 %v1785_v20  ;;  %v1821_v8 = vpack.c.bf16 %v1809_v24, %v1808_v23 }
 0x5ab   : > { %v3834_v17 = vpop.eup %3833 }
 0x5ac   : > { %3609 = vmatmul.mubr.msk.bf16.gmra.mxu0 %vm1641_vm3, %v1821_v8  ;;  %v1811_v22 = vmul.f32 %v3834_v17, %v4410_v61  ;;  %v3836_v26 = vpop.eup %3835 }
 0x5ad   : > { %v1812_v41 = vmul.f32 %v3836_v26, %v4408_v31  ;;  %3645 = vmatpush3.bf16.msra.mxu0 %v3781_v37 }
 0x5ae   : > { %v1822_v29 = vpack.c.bf16 %v1811_v22, %v1810_v19  ;;  %3646 = vmatprep.subr.bf16.mxu0 %v3782_v9 }
 0x5af   : > { %v3838_v30 = vpop.eup %3837 }
 0x5b0   : > { %3612 = vmatprep.mubr.msk.bf16.mxu0 %vm1641_vm3, %v1822_v29  ;;  %v1813_v18 = vmul.f32 %v3838_v30, %v4416_v48  ;;  %v3840_v27 = vpop.eup %3839 }
 0x5b1   : > { %v1814_v28 = vmul.f32 %v3840_v27, %v4418_v52  ;;  %3647 = vmatpush3.bf16.msra.mxu0 %v3782_v9 }
 0x5b2   : > { %v1823_v21 = vpack.c.bf16 %v1813_v18, %v1812_v41 }
 0x5b3   : > { %v3842_v55 = vpop.eup %3841 }
 0x5b4   : > { %v3844_v45 = vpop.eup %3843  ;;  %3613 = vmatmul.mubr.msk.bf16.gmra.mxu0 %vm1641_vm3, %v1823_v21  ;;  %v1815_v61 = vmul.f32 %v3842_v55, %v4426_v3 }
 0x5b5   : > { %v1816_v33 = vmul.f32 %v3844_v45, %v4424_v0 }
 0x5b6   : > { %v1824_v32 = vpack.c.bf16 %v1815_v61, %v1814_v28 }
 0x5b7   : > { %v3846_v58 = vpop.eup %3845 }
 0x5b8   : > { %v1817_v31 = vmul.f32 %v3846_v58, %v4432_v34  ;;  %3616 = vmatprep.mubr.msk.bf16.mxu0 %vm1641_vm3, %v1824_v32 }
 0x5ba   : > { %v1825_v48 = vpack.c.bf16 %v1817_v31, %v1816_v33 }
 0x5bc   : > { %3617 = vmatmul.mubr.msk.bf16.gmra.mxu0 %vm1641_vm3, %v1825_v48 }
 0x663   : > { %v3606_v52 = vpop.f32.mrf.mxu0 }
 0x664   : > { %1952 = vst.msk [vmem:[#allocation2 + $0x10] sm:$0xff] %vm710_vm2, %v3606_v52 }
 0x665   : > { %v1887_v0 = vpop.f32.mrf.mxu0 }
 0x666   : > { %1950 = vst.msk [vmem:[#allocation2] sm:$0xff] %vm710_vm2, %v1887_v0 }
 0x667   : > { %v3607_v3 = vpop.f32.mrf.mxu0 }
 0x668   : > { %1953 = vst.msk [vmem:[#allocation2 + $0x18] sm:$0xff] %vm710_vm2, %v3607_v3  ;;  %v1983_v43 = vpack.c.bf16 %v3607_v3, %v3606_v52 }
 0x669   : > { %v1890_v34 = vpop.f32.mrf.mxu0 }
 0x66a   : > { %1951 = vst.msk [vmem:[#allocation2 + $0x8] sm:$0xff] %vm710_vm2, %v1890_v34  ;;  %v1982_v42 = vpack.c.bf16 %v1890_v34, %v1887_v0 }
 0x66c   : > { %v3610_v44 = vpop.f32.mrf.mxu0  ;;  %3624 = vmatprep.mubr.msk.bf16.mxu1 %vm710_vm2, %v1982_v42 }
 0x66d   : > { %1956 = vst.msk [vmem:[#allocation2 + $0x30] sm:$0xff] %vm710_vm2, %v3610_v44  ;;  %3625 = vmatmul.mubr.msk.bf16.vlgmr.msra.gmra.mxu1 %vm710_vm2, %v1983_v43 }
 0x66e   : > { %v1903_v46 = vpop.f32.mrf.mxu0 }
 0x66f   : > { %1954 = vst.msk [vmem:[#allocation2 + $0x20] sm:$0xff] %vm710_vm2, %v1903_v46 }
 0x670   : > { %v3611_v49 = vpop.f32.mrf.mxu0 }
 0x671   : > { %1957 = vst.msk [vmem:[#allocation2 + $0x38] sm:$0xff] %vm710_vm2, %v3611_v49  ;;  %v1985_v53 = vpack.c.bf16 %v3611_v49, %v3610_v44 }
 0x672   : > { %v1906_v39 = vpop.f32.mrf.mxu0 }
 0x673   : > { %1955 = vst.msk [vmem:[#allocation2 + $0x28] sm:$0xff] %vm710_vm2, %v1906_v39  ;;  %v1984_v38 = vpack.c.bf16 %v1906_v39, %v1903_v46 }
 0x674   : > { %v3614_v54 = vpop.f32.mrf.mxu0 }
 0x675   : > { %1960 = vst.msk [vmem:[#allocation2 + $0x50] sm:$0xff] %vm710_vm2, %v3614_v54  ;;  %3628 = vmatprep.mubr.msk.bf16.mxu1 %vm710_vm2, %v1984_v38 }
 0x676   : > { %v1919_v56 = vpop.f32.mrf.mxu0  ;;  %3629 = vmatmul.mubr.msk.bf16.gmra.mxu1 %vm710_vm2, %v1985_v53 }
 0x677   : > { %1958 = vst.msk [vmem:[#allocation2 + $0x40] sm:$0xff] %vm710_vm2, %v1919_v56 }
 0x678   : > { %v3615_v57 = vpop.f32.mrf.mxu0 }
 0x679   : > { %1961 = vst.msk [vmem:[#allocation2 + $0x58] sm:$0xff] %vm710_vm2, %v3615_v57  ;;  %v1987_v62 = vpack.c.bf16 %v3615_v57, %v3614_v54 }
 0x67a   : > { %v1922_v59 = vpop.f32.mrf.mxu0 }
 0x67b   : > { %1959 = vst.msk [vmem:[#allocation2 + $0x48] sm:$0xff] %vm710_vm2, %v1922_v59  ;;  %v1986_v60 = vpack.c.bf16 %v1922_v59, %v1919_v56 }
 0x67c   : > { %v3618_v63 = vpop.f32.mrf.mxu0 }
 0x67d   : > { %1964 = vst.msk [vmem:[#allocation2 + $0x70] sm:$0xff] %vm710_vm2, %v3618_v63  ;;  %3632 = vmatprep.mubr.msk.bf16.mxu1 %vm710_vm2, %v1986_v60 }
 0x67e   : > { %v1935_v1 = vpop.f32.mrf.mxu0  ;;  %3633 = vmatmul.mubr.msk.bf16.gmra.mxu1 %vm710_vm2, %v1987_v62 }
 0x67f   : > { %1962 = vst.msk [vmem:[#allocation2 + $0x60] sm:$0xff] %vm710_vm2, %v1935_v1 }
 0x680   : > { %v3619_v4 = vpop.f32.mrf.mxu0 }
 0x681   : > { %1965 = vst.msk [vmem:[#allocation2 + $0x78] sm:$0xff] %vm710_vm2, %v3619_v4  ;;  %v1989_v7 = vpack.c.bf16 %v3619_v4, %v3618_v63  ;;  %v3326_v4 = vld [vmem:[%s2171_s29] ss:$0 sm:$0xff] }
 0x682   : > { %v1938_v5 = vpop.f32.mrf.mxu0 }
 0x683   : > { %1963 = vst.msk [vmem:[#allocation2 + $0x68] sm:$0xff] %vm710_vm2, %v1938_v5  ;;  %v1988_v6 = vpack.c.bf16 %v1938_v5, %v1935_v1  ;;  %v3946_v1 = vmov 64  }
 0x684   : > { %3761 = vset.pattern.permute.xlu1 %v3946_v1  ;;  %3762 = vset.pattern.permute.xlu0 %v3946_v1 }
 0x685   : > { %3636 = vmatprep.mubr.msk.bf16.mxu1 %vm710_vm2, %v1988_v6 }
 0x686   : > { %3637 = vmatmul.mubr.msk.bf16.gmra.mxu1 %vm710_vm2, %v1989_v7 }
 0x72d   : > { %v3626_v10 = vpop.f32.mrf.mxu1 }
 0x72e   : > { %v2083_v15 = vadd.f32 %v3626_v10, %v3314_v51 }
 0x72f   : > { %v2074_v11 = vpop.f32.mrf.mxu1 }
 0x730   : > { %v2075_v50 = vadd.f32 %v3314_v51, %v2074_v11  ;;  %v2139_v24 = vmax.f32 %v2083_v15, 0.0 }
 0x731   : > { %v3627_v12 = vpop.f32.mrf.mxu1 }
 0x732   : > { %v2086_v14 = vadd.f32 %v3627_v12, %v3314_v51  ;;  %v2137_v16 = vmax.f32 %v2075_v50, 0.0 }
 0x733   : > { %v2077_v40 = vpop.f32.mrf.mxu1 }
 0x734   : > { %v2078_v13 = vadd.f32 %v3314_v51, %v2077_v40  ;;  %v2140_v2 = vmax.f32 %v2086_v14, 0.0 }
 0x736   : > { %v2138_v20 = vmax.f32 %v2078_v13, 0.0  ;;  %v3630_v23 = vpop.f32.mrf.mxu1  ;;  %v2154_v17 = vpack.c.bf16 %v2140_v2, %v2139_v24 }
 0x737   : > { %v2099_v29 = vadd.f32 %v3630_v23, %v3314_v51 }
 0x738   : > { %v2153_v25 = vpack.c.bf16 %v2138_v20, %v2137_v16  ;;  %v2090_v8 = vpop.f32.mrf.mxu1 }
 0x739   : > { %v2091_v22 = vadd.f32 %v3314_v51, %v2090_v8  ;;  %v2143_v45 = vmax.f32 %v2099_v29, 0.0 }
 0x73a   : > { %v3631_v19 = vpop.f32.mrf.mxu1  ;;  %3648 = vmatprep.mubr.msk.bf16.mxu0 %vm2203_vm5, %v2153_v25 }
 0x73b   : > { %v2102_v26 = vadd.f32 %v3631_v19, %v3314_v51  ;;  %3649 = vmatmul.mubr.msk.bf16.vlgmr.msra.gmra.mxu0 %vm2203_vm5, %v2154_v17  ;;  %v2141_v21 = vmax.f32 %v2091_v22, 0.0 }
 0x73c   : > { %v2093_v30 = vpop.f32.mrf.mxu1 }
 0x73d   : > { %v2094_v41 = vadd.f32 %v3314_v51, %v2093_v30  ;;  %v2144_v18 = vmax.f32 %v2102_v26, 0.0 }
 0x73e   : > { %v3634_v27 = vpop.f32.mrf.mxu1 }
 0x73f   : > { %v2142_v55 = vmax.f32 %v2094_v41, 0.0  ;;  %v2156_v58 = vpack.c.bf16 %v2144_v18, %v2143_v45  ;;  %v2115_v48 = vadd.f32 %v3634_v27, %v3314_v51 }
 0x740   : > { %v2106_v28 = vpop.f32.mrf.mxu1 }
 0x741   : > { %v2155_v61 = vpack.c.bf16 %v2142_v55, %v2141_v21  ;;  %v2107_v33 = vadd.f32 %v3314_v51, %v2106_v28  ;;  %v2147_v34 = vmax.f32 %v2115_v48, 0.0 }
 0x742   : > { %v3635_v32 = vpop.f32.mrf.mxu1 }
 0x743   : > { %v2118_v31 = vadd.f32 %v3635_v32, %v3314_v51  ;;  %3652 = vmatprep.mubr.msk.bf16.mxu0 %vm2203_vm5, %v2155_v61  ;;  %v2145_v0 = vmax.f32 %v2107_v33, 0.0 }
 0x744   : > { %v2109_v35 = vpop.f32.mrf.mxu1  ;;  %3653 = vmatmul.mubr.msk.bf16.gmra.mxu0 %vm2203_vm5, %v2156_v58 }
 0x745   : > { %v2110_v36 = vadd.f32 %v3314_v51, %v2109_v35  ;;  %v2148_v37 = vmax.f32 %v2118_v31, 0.0 }
 0x746   : > { %v3638_v52 = vpop.f32.mrf.mxu1 }
 0x747   : > { %v2146_v3 = vmax.f32 %v2110_v36, 0.0  ;;  %v2158_v44 = vpack.c.bf16 %v2148_v37, %v2147_v34  ;;  %v2131_v38 = vadd.f32 %v3638_v52, %v3314_v51  ;;  %v4561_v36 = vld [vmem:[%s4953_s3 + $0x20] sm:$0xff]  ;;  %v4566_v37 = vld [vmem:[%s4953_s3 + $0x10] sm:$0xff]  ;;  %v4581_v34 = vld [vmem:[%s4953_s3 + $0x18] sm:$0xff] }
 0x748   : > { %v2122_v42 = vpop.f32.mrf.mxu1  ;;  %v4571_v52 = vld [vmem:[%s4953_s3] sm:$0xff]  ;;  %vm2329_vm6 = vcmp.gt.f32.partialorder %v4561_v36, 0.0  ;;  %vm2327_vm7 = vcmp.gt.f32.partialorder %v4566_v37, 0.0  ;;  %vm2328_vm11 = vcmp.gt.f32.partialorder %v4581_v34, 0.0 }
 0x749   : > { %v2157_v43 = vpack.c.bf16 %v2146_v3, %v2145_v0  ;;  %v2123_v49 = vadd.f32 %v3314_v51, %v2122_v42  ;;  %v2151_v60 = vmax.f32 %v2131_v38, 0.0  ;;  %v4576_v0 = vld [vmem:[%s4953_s3 + $0x38] sm:$0xff]  ;;  %v4586_v42 = vld [vmem:[%s4953_s3 + $0x8] sm:$0xff]  ;;  %v4614_v38 = vld [vmem:[%s4953_s3 + $0x50] sm:$0xff]  ;;  %vm2325_vm10 = vcmp.gt.f32.partialorder %v4571_v52, 0.0 }
 0x74a   : > { %v3639_v46 = vpop.f32.mrf.mxu1  ;;  %vm2332_vm9 = vcmp.gt.f32.partialorder %v4576_v0, 0.0  ;;  %vm2326_vm12 = vcmp.gt.f32.partialorder %v4586_v42, 0.0  ;;  %vm2335_vm1 = vcmp.gt.f32.partialorder %v4614_v38, 0.0 }
 0x74b   : > { %v2134_v39 = vadd.f32 %v3639_v46, %v3314_v51  ;;  %3656 = vmatprep.mubr.msk.bf16.mxu0 %vm2203_vm5, %v2157_v43  ;;  %v2149_v57 = vmax.f32 %v2123_v49, 0.0  ;;  %v4591_v43 = vld [vmem:[%s4953_s3 + $0x28] sm:$0xff]  ;;  %v4602_v46 = vld [vmem:[%s4953_s3 + $0x58] sm:$0xff] }
 0x74c   : > { %v2125_v53 = vpop.f32.mrf.mxu1  ;;  %3657 = vmatmul.mubr.msk.bf16.gmra.mxu0 %vm2203_vm5, %v2158_v44  ;;  %v4596_v44 = vld [vmem:[%s4953_s3 + $0x30] sm:$0xff]  ;;  %v4607_v49 = vld [vmem:[%s4953_s3 + $0x48] sm:$0xff]  ;;  %vm2330_vm13 = vcmp.gt.f32.partialorder %v4591_v43, 0.0  ;;  %vm2336_vm15 = vcmp.gt.f32.partialorder %v4602_v46, 0.0 }
 0x74d   : > { %v2126_v54 = vadd.f32 %v3314_v51, %v2125_v53  ;;  %v2152_v56 = vmax.f32 %v2134_v39, 0.0  ;;  %v4619_v53 = vld [vmem:[%s4953_s3 + $0x40] sm:$0xff]  ;;  %vm2331_vm14 = vcmp.gt.f32.partialorder %v4596_v44, 0.0  ;;  %vm2334_vm0 = vcmp.gt.f32.partialorder %v4607_v49, 0.0 }
 0x74e   : > { %vm2333_vm2 = vcmp.gt.f32.partialorder %v4619_v53, 0.0 }
 0x74f   : > { %v2150_v59 = vmax.f32 %v2126_v54, 0.0  ;;  %v2160_v63 = vpack.c.bf16 %v2152_v56, %v2151_v60  ;;  %v4638_v60 = vld [vmem:[%s4953_s3 + $0x78] sm:$0xff] }
 0x750   : > { %vm2340_vm4 = vcmp.gt.f32.partialorder %v4638_v60, 0.0 }
 0x751   : > { %v2159_v62 = vpack.c.bf16 %v2150_v59, %v2149_v57  ;;  %v4631_v57 = vld [vmem:[%s4953_s3 + $0x68] sm:$0xff] }
 0x752   : > { %vm2338_vm3 = vcmp.gt.f32.partialorder %v4631_v57, 0.0 }
 0x753   : > { %3660 = vmatprep.mubr.msk.bf16.mxu0 %vm2203_vm5, %v2159_v62  ;;  %v4643_v62 = vld [vmem:[%s4953_s3 + $0x60] sm:$0xff] }
 0x754   : > { %3661 = vmatmul.mubr.msk.bf16.gmra.mxu0 %vm2203_vm5, %v2160_v63 }
 0x7fb   : > { %v3650_v5 = vpop.f32.mrf.mxu0 }
 0x7fc   : > { %v4510_v6 = vadd.f32 %v3650_v5, %v3326_v4 }
 0x7fd   : > { %v2262_v7 = vpop.f32.mrf.mxu0 }
 0x7fe   : > { %v4512_v9 = vadd.f32 %v3326_v4, %v2262_v7  ;;  %2353 = vperm.xlu1 %3761, %v4510_v6  }
 0x7ff   : > { %v3651_v10 = vpop.f32.mrf.mxu0 }
 0x800   : > { %4971 = vst [vmem:[#allocation8_spill] sm:$0xff] %v4512_v9  ;;  %v4515_v11 = vadd.f32 %v3651_v10, %v3326_v4  ;;  %2343 = vperm.xlu0 %3762, %v4512_v9  }
 0x801   : > { %v2265_v51 = vpop.f32.mrf.mxu0 }
 0x802   : > { %4972 = vst [vmem:[#allocation9_spill] sm:$0xff] %v4515_v11  ;;  %2358 = vperm.xlu1 %3761, %v4515_v11   ;;  %v4519_v12 = vadd.f32 %v3326_v4, %v2265_v51 }
 0x804   : > { %4973 = vst [vmem:[#allocation10_spill] sm:$0xff] %v4519_v12  ;;  %v3654_v50 = vpop.f32.mrf.mxu0 }
 0x805   : > { %v4522_v15 = vadd.f32 %v3654_v50, %v3326_v4 }
 0x806   : > { %v2278_v14 = vpop.f32.mrf.mxu0  ;;  %2348 = vperm.xlu1 %3761, %v4519_v12  }
 0x807   : > { %v4525_v2 = vadd.f32 %v3326_v4, %v2278_v14 }
 0x808   : > { %v3655_v40 = vpop.f32.mrf.mxu0 }
 0x809   : > { %v4528_v23 = vadd.f32 %v3655_v40, %v3326_v4 }
 0x80a   : > { %v2281_v13 = vpop.f32.mrf.mxu0  ;;  %2373 = vperm.xlu1 %3761, %v4522_v15  }
 0x80b   : > { %v4534_v17 = vadd.f32 %v3326_v4, %v2281_v13 }
 0x80c   : > { %v3658_v16 = vpop.f32.mrf.mxu0 }
 0x80d   : > { %v4540_v29 = vadd.f32 %v3658_v16, %v3326_v4 }
 0x80e   : > { %v2294_v20 = vpop.f32.mrf.mxu0  ;;  %2363 = vperm.xlu1 %3761, %v4525_v2  }
 0x80f   : > { %v4545_v27 = vadd.f32 %v3326_v4, %v2294_v20 }
 0x810   : > { %v3659_v24 = vpop.f32.mrf.mxu0 }
 0x811   : > { %v4530_v25 = vadd.f32 %v3659_v24, %v3326_v4 }
 0x812   : > { %v2297_v8 = vpop.f32.mrf.mxu0  ;;  %2378 = vperm.xlu1 %3761, %v4528_v23  }
 0x813   : > { %2398 = vperm.xlu0 %3762, %v4530_v25   ;;  %v4536_v22 = vadd.f32 %v3326_v4, %v2297_v8 }
 0x814   : > { %v3662_v19 = vpop.f32.mrf.mxu0 }
 0x815   : > { %v4555_v45 = vadd.f32 %v3662_v19, %v3326_v4 }
 0x816   : > { %v2310_v26 = vpop.f32.mrf.mxu0  ;;  %2368 = vperm.xlu1 %3761, %v4534_v17  }
 0x817   : > { %2388 = vperm.xlu0 %3762, %v4536_v22   ;;  %v4551_v55 = vadd.f32 %v3326_v4, %v2310_v26 }
 0x818   : > { %v3663_v30 = vpop.f32.mrf.mxu0 }
 0x819   : > { %v4549_v21 = vadd.f32 %v3663_v30, %v3326_v4 }
 0x81a   : > { %v2313_v41 = vpop.f32.mrf.mxu0  ;;  %2393 = vperm.xlu1 %3761, %v4540_v29  }
 0x81b   : > { %v4543_v18 = vadd.f32 %v3326_v4, %v2313_v41 }
 0x81d   : > { %2408 = vperm.xlu0 %3762, %v4543_v18  }
 0x81e   : > { %2383 = vperm.xlu1 %3761, %v4545_v27  }
 0x821   : > { %2418 = vperm.xlu0 %3762, %v4549_v21  }
 0x822   : > { %2403 = vperm.xlu1 %3761, %v4551_v55  }
 0x826   : > { %2413 = vperm.xlu1 %3761, %v4555_v45  }
 0x879   : > { %v2354_v28 = vpop.permute.xlu1 %2353 }
 0x87a   : > { %v2423_v13 = vsel %vm2327_vm7, %v2354_v28, -1e+30 }
 0x87b   : > { %v2344_v31 = vpop.permute.xlu0 %2343 }
 0x87c   : > { %v2421_v63 = vsel %vm2325_vm10, %v2344_v31, -1e+30 }
 0x87d   : > { %v2359_v61 = vpop.permute.xlu1 %2358  ;;  %v2438_v16 = vsel %vm2437_vm8, %v2421_v63, -inf }
 0x87e   : > { %v2424_v1 = vsel %vm2328_vm11, %v2359_v61, -1e+30  ;;  %v4664_v61 = vld [vmem:[%s4953_s3 + $0x70] sm:$0xff] }
 0x87f   : > { %v2441_v20 = vsel %vm2437_vm8, %v2424_v1, -inf  ;;  %vm2339_vm7 = vcmp.gt.f32.partialorder %v4664_v61, 0.0 }
 0x881   : > { %v2349_v58 = vpop.permute.xlu1 %2348 }
 0x882   : > { %v2422_v7 = vsel %vm2326_vm12, %v2349_v58, -1e+30 }
 0x883   : > { %v2439_v8 = vsel %vm2437_vm8, %v2422_v7, -inf }
 0x885   : > { %v2374_v32 = vpop.permute.xlu1 %2373 }
 0x886   : > { %v2427_v10 = vsel %vm2331_vm14, %v2374_v32, -1e+30 }
 0x887   : > { %v2446_v19 = vsel %vm2437_vm8, %v2427_v10, -inf }
 0x889   : > { %v2364_v33 = vpop.permute.xlu1 %2363 }
 0x88a   : > { %v2425_v56 = vsel %vm2329_vm6, %v2364_v33, -1e+30  ;;  %vm2337_vm6 = vcmp.gt.f32.partialorder %v4643_v62, 0.0 }
 0x88b   : > { %v2442_v51 = vsel %vm2437_vm8, %v2425_v56, -inf }
 0x88c   : > { %v2443_v26 = vmax.f32 %v2438_v16, %v2442_v51 }
 0x88d   : > { %v2379_v48 = vpop.permute.xlu1 %2378 }
 0x88e   : > { %v2399_v35 = vpop.permute.xlu0 %2398  ;;  %v2428_v59 = vsel %vm2332_vm9, %v2379_v48, -1e+30  ;;  %vm2963_vm9 = vcmask 517120  }
 0x88f   : > { %v2448_v14 = vsel %vm2437_vm8, %v2428_v59, -inf  ;;  %v2432_v58 = vsel %vm2336_vm15, %v2399_v35, -1e+30  ;;  %v2440_v59 = vsel %vm2437_vm8, %v2423_v13, -inf }
 0x890   : > { %v2449_v28 = vmax.f32 %v2441_v20, %v2448_v14  ;;  %v2456_v1 = vsel %vm2437_vm8, %v2432_v58, -inf }
 0x891   : > { %v2369_v3 = vpop.permute.xlu1 %2368 }
 0x892   : > { %v2389_v39 = vpop.permute.xlu0 %2388  ;;  %v2426_v4 = vsel %vm2330_vm13, %v2369_v3, -1e+30  ;;  %v2457_v7 = vmax.f32 %v2449_v28, %v2456_v1 }
 0x893   : > { %v2444_v24 = vsel %vm2437_vm8, %v2426_v4, -inf  ;;  %v2430_v32 = vsel %vm2334_vm0, %v2389_v39, -1e+30  ;;  %v2447_v39 = vmax.f32 %v2440_v59, %v2446_v19 }
 0x894   : > { %v2445_v48 = vmax.f32 %v2439_v8, %v2444_v24 }
 0x895   : > { %v2394_v54 = vpop.permute.xlu1 %2393 }
 0x896   : > { %v2431_v30 = vsel %vm2335_vm1, %v2394_v54, -1e+30 }
 0x897   : > { %v2454_v35 = vsel %vm2437_vm8, %v2431_v30, -inf }
 0x898   : > { %v2409_v5 = vpop.permute.xlu0 %2408 }
 0x899   : > { %v2384_v50 = vpop.permute.xlu1 %2383  ;;  %v2434_v3 = vsel %vm2338_vm3, %v2409_v5, -1e+30  ;;  %v2452_v5 = vsel %vm2437_vm8, %v2430_v32, -inf }
 0x89a   : > { %v2429_v40 = vsel %vm2333_vm2, %v2384_v50, -1e+30  ;;  %v2460_v10 = vsel %vm2437_vm8, %v2434_v3, -inf  ;;  %v2453_v14 = vmax.f32 %v2445_v48, %v2452_v5 }
 0x89b   : > { %v2450_v33 = vsel %vm2437_vm8, %v2429_v40, -inf  ;;  %v2455_v40 = vmax.f32 %v2447_v39, %v2454_v35 }
 0x89c   : > { %v2419_v41 = vpop.permute.xlu0 %2418  ;;  %v2451_v4 = vmax.f32 %v2443_v26, %v2450_v33  ;;  %v2461_v24 = vmax.f32 %v2453_v14, %v2460_v10 }
 0x89d   : > { %v2404_v31 = vpop.permute.xlu1 %2403  ;;  %v2436_v54 = vsel %vm2340_vm4, %v2419_v41, -1e+30 }
 0x89e   : > { %v2433_v56 = vsel %vm2337_vm6, %v2404_v31, -1e+30  ;;  %v2464_v51 = vsel %vm2437_vm8, %v2436_v54, -inf }
 0x89f   : > { %v2458_v63 = vsel %vm2437_vm8, %v2433_v56, -inf  ;;  %v2465_v8 = vmax.f32 %v2457_v7, %v2464_v51 }
 0x8a0   : > { %v2459_v13 = vmax.f32 %v2451_v4, %v2458_v63 }
 0x8a1   : > { %v2414_v50 = vpop.permute.xlu1 %2413 }
 0x8a2   : > { %v2435_v16 = vsel %vm2339_vm7, %v2414_v50, -1e+30  ;;  %v2466_v30 = vmax.f32 %v2459_v13, %v2461_v24 }
 0x8a3   : > { %v2462_v20 = vsel %vm2437_vm8, %v2435_v16, -inf }
 0x8a4   : > { %v2463_v19 = vmax.f32 %v2455_v40, %v2462_v20 }
 0x8a6   : > { %v2467_v41 = vmax.f32 %v2463_v19, %v2465_v8 }
 0x8a8   : > { %v2468_v26 = vmax.f32 %v2466_v30, %v2467_v41 }
 0x8aa   : > { %v2469_v28 = vrot.slane %v2468_v26, 4 }
 0x8ac   : > { %v2470_v58 = vmax.f32 %v2468_v26, %v2469_v28 }
 0x8ae   : > { %v2471_v32 = vrot.slane %v2470_v58, 2 }
 0x8b0   : > { %v2472_v33 = vmax.f32 %v2470_v58, %v2471_v32 }
 0x8b2   : > { %v2473_v31 = vrot.slane %v2472_v33, 1 }
 0x8b4   : > { %v2474_v3 = vmax.f32 %v2472_v33, %v2473_v31 }
 0x8b6   : > { %v2476_v54 = vmul.f32 %v2474_v3, %v4586_v42  ;;  %v2475_v48 = vmul.f32 %v2474_v3, %v4571_v52  ;;  %v2477_v35 = vmul.f32 %v2474_v3, %v4566_v37  ;;  %v2478_v63 = vmul.f32 %v2474_v3, %v4581_v34 }
 0x8b7   : > { %v2479_v4 = vmul.f32 %v2474_v3, %v4561_v36  ;;  %v2480_v7 = vmul.f32 %v2474_v3, %v4591_v43  ;;  %v2481_v51 = vmul.f32 %v2474_v3, %v4596_v44  ;;  %v2482_v50 = vmul.f32 %v2474_v3, %v4576_v0 }
 0x8b8   : > { %v2494_v56 = vsel %vm2437_vm8, %v2476_v54, 0.0  ;;  %v2491_v59 = vsel %vm2437_vm8, %v2475_v48, 0.0  ;;  %v2497_v39 = vsel %vm2437_vm8, %v2477_v35, 0.0  ;;  %v2500_v1 = vsel %vm2437_vm8, %v2478_v63, 0.0 }
 0x8b9   : > { %2495 = vadd.xlane.f32.xlu0 %v2494_v56  ;;  %2492 = vadd.xlane.f32.xlu1 %v2491_v59  ;;  %v2503_v5 = vsel %vm2437_vm8, %v2479_v4, 0.0  ;;  %v2506_v10 = vsel %vm2437_vm8, %v2480_v7, 0.0  ;;  %v2509_v14 = vsel %vm2437_vm8, %v2481_v51, 0.0  ;;  %v2512_v40 = vsel %vm2437_vm8, %v2482_v50, 0.0 }
 0x8ba   : > { %v2483_v13 = vmul.f32 %v2474_v3, %v4619_v53  ;;  %v2484_v16 = vmul.f32 %v2474_v3, %v4607_v49  ;;  %v2485_v8 = vmul.f32 %v2474_v3, %v4614_v38  ;;  %v2486_v19 = vmul.f32 %v2474_v3, %v4602_v46 }
 0x8bb   : > { %v2487_v26 = vmul.f32 %v2474_v3, %v4643_v62  ;;  %v2488_v28 = vmul.f32 %v2474_v3, %v4631_v57  ;;  %v2489_v33 = vmul.f32 %v2474_v3, %v4664_v61  ;;  %v2490_v31 = vmul.f32 %v2474_v3, %v4638_v60 }
 0x8bc   : > { %v2515_v20 = vsel %vm2437_vm8, %v2483_v13, 0.0  ;;  %v2518_v24 = vsel %vm2437_vm8, %v2484_v16, 0.0  ;;  %v2521_v30 = vsel %vm2437_vm8, %v2485_v8, 0.0  ;;  %v2524_v41 = vsel %vm2437_vm8, %v2486_v19, 0.0 }
 0x8bd   : > { %2498 = vadd.xlane.f32.xlu0 %v2497_v39  ;;  %2501 = vadd.xlane.f32.xlu1 %v2500_v1  ;;  %v2527_v58 = vsel %vm2437_vm8, %v2487_v26, 0.0  ;;  %v2530_v32 = vsel %vm2437_vm8, %v2488_v28, 0.0  ;;  %v2533_v54 = vsel %vm2437_vm8, %v2489_v33, 0.0  ;;  %v2536_v48 = vsel %vm2437_vm8, %v2490_v31, 0.0 }
 0x8c1   : > { %2504 = vadd.xlane.f32.xlu0 %v2503_v5  ;;  %2507 = vadd.xlane.f32.xlu1 %v2506_v10 }
 0x8c5   : > { %2510 = vadd.xlane.f32.xlu0 %v2509_v14  ;;  %2513 = vadd.xlane.f32.xlu1 %v2512_v40 }
 0x8c9   : > { %2516 = vadd.xlane.f32.xlu0 %v2515_v20  ;;  %2519 = vadd.xlane.f32.xlu1 %v2518_v24 }
 0x8cd   : > { %2522 = vadd.xlane.f32.xlu0 %v2521_v30  ;;  %2525 = vadd.xlane.f32.xlu1 %v2524_v41 }
 0x8d1   : > { %2528 = vadd.xlane.f32.xlu0 %v2527_v58  ;;  %2531 = vadd.xlane.f32.xlu1 %v2530_v32 }
 0x8d5   : > { %2534 = vadd.xlane.f32.xlu0 %v2533_v54  ;;  %2537 = vadd.xlane.f32.xlu1 %v2536_v48 }
 0x942   : > { %v2496_v56 = vpop.xlane.xlu0 %2495  ;;  %v2493_v59 = vpop.xlane.xlu1 %2492 }
 0x943   : > { %v2540_v35 = vsub.f32 %v4519_v12, %v2496_v56  ;;  %v2539_v63 = vsub.f32 %v4512_v9, %v2493_v59 }
 0x945   : > { %v2556_v39 = vmin.f32 %v2540_v35, 0.0  ;;  %v2555_v1 = vmin.f32 %v2539_v63, 0.0 }
 0x946   : > { %v2499_v4 = vpop.xlane.xlu0 %2498  ;;  %v2502_v7 = vpop.xlane.xlu1 %2501 }
 0x947   : > { %v2573_v5 = vmul.f32 1.442695, %v2556_v39  ;;  %v2571_v3 = vmul.f32 1.442695, %v2555_v1  ;;  %v2541_v10 = vsub.f32 %v4510_v6, %v2499_v4  ;;  %v2542_v51 = vsub.f32 %v4515_v11, %v2502_v7 }
 0x949   : > { %3847 = vpow2.f32 %v2573_v5  ;;  %v2557_v50 = vmin.f32 %v2541_v10, 0.0  ;;  %v2558_v14 = vmin.f32 %v2542_v51, 0.0 }
 0x94a   : > { %3849 = vpow2.f32 %v2571_v3  ;;  %v2505_v40 = vpop.xlane.xlu0 %2504  ;;  %v2508_v13 = vpop.xlane.xlu1 %2507 }
 0x94b   : > { %v2575_v16 = vmul.f32 1.442695, %v2557_v50  ;;  %v2577_v20 = vmul.f32 1.442695, %v2558_v14  ;;  %v2543_v24 = vsub.f32 %v4525_v2, %v2505_v40  ;;  %v2544_v8 = vsub.f32 %v4534_v17, %v2508_v13 }
 0x94d   : > { %3851 = vpow2.f32 %v2575_v16  ;;  %v2559_v19 = vmin.f32 %v2543_v24, 0.0  ;;  %v2560_v30 = vmin.f32 %v2544_v8, 0.0 }
 0x94e   : > { %3853 = vpow2.f32 %v2577_v20  ;;  %v2511_v41 = vpop.xlane.xlu0 %2510  ;;  %v2514_v26 = vpop.xlane.xlu1 %2513 }
 0x94f   : > { %v2579_v28 = vmul.f32 1.442695, %v2559_v19  ;;  %v2581_v58 = vmul.f32 1.442695, %v2560_v30  ;;  %v2545_v32 = vsub.f32 %v4522_v15, %v2511_v41  ;;  %v2546_v33 = vsub.f32 %v4528_v23, %v2514_v26 }
 0x951   : > { %3855 = vpow2.f32 %v2579_v28  ;;  %v2561_v31 = vmin.f32 %v2545_v32, 0.0  ;;  %v2562_v54 = vmin.f32 %v2546_v33, 0.0 }
 0x952   : > { %3857 = vpow2.f32 %v2581_v58  ;;  %v2517_v48 = vpop.xlane.xlu0 %2516  ;;  %v2520_v56 = vpop.xlane.xlu1 %2519 }
 0x953   : > { %v2583_v59 = vmul.f32 1.442695, %v2561_v31  ;;  %v2585_v35 = vmul.f32 1.442695, %v2562_v54  ;;  %v2547_v63 = vsub.f32 %v4545_v27, %v2517_v48  ;;  %v2548_v39 = vsub.f32 %v4536_v22, %v2520_v56 }
 0x955   : > { %3859 = vpow2.f32 %v2583_v59  ;;  %v2563_v1 = vmin.f32 %v2547_v63, 0.0  ;;  %v2564_v4 = vmin.f32 %v2548_v39, 0.0 }
 0x956   : > { %v4728_v7 = vpop.eup %3847  ;;  %3861 = vpow2.f32 %v2585_v35  ;;  %v2523_v5 = vpop.xlane.xlu0 %2522 }
 0x957   : > { %v2526_v3 = vpop.xlane.xlu1 %2525  ;;  %v4730_v10 = vpop.eup %3849  ;;  %v2587_v51 = vmul.f32 1.442695, %v2563_v1  ;;  %v2589_v50 = vmul.f32 1.442695, %v2564_v4  ;;  %v2549_v14 = vsub.f32 %v4540_v29, %v2523_v5  ;;  %2610 = vperm.xlu1 %3761, %v4728_v7  }
 0x958   : > { %v2550_v40 = vsub.f32 %v4530_v25, %v2526_v3  ;;  %2605 = vperm.xlu0 %3762, %v4730_v10  }
 0x959   : > { %3863 = vpow2.f32 %v2587_v51  ;;  %v2565_v13 = vmin.f32 %v2549_v14, 0.0 }
 0x95a   : > { %v2566_v16 = vmin.f32 %v2550_v40, 0.0  ;;  %v4736_v20 = vpop.eup %3851  ;;  %3865 = vpow2.f32 %v2589_v50  ;;  %v2529_v24 = vpop.xlane.xlu0 %2528 }
 0x95b   : > { %v2532_v8 = vpop.xlane.xlu1 %2531  ;;  %v4738_v19 = vpop.eup %3853  ;;  %v2591_v30 = vmul.f32 1.442695, %v2565_v13  ;;  %v2551_v26 = vsub.f32 %v4551_v55, %v2529_v24  ;;  %2615 = vperm.xlu1 %3761, %v4736_v20  }
 0x95c   : > { %v2593_v41 = vmul.f32 1.442695, %v2566_v16  ;;  %v2552_v28 = vsub.f32 %v4543_v18, %v2532_v8  ;;  %2620 = vperm.xlu0 %3762, %v4738_v19  }
 0x95d   : > { %3867 = vpow2.f32 %v2591_v30  ;;  %v2567_v58 = vmin.f32 %v2551_v26, 0.0 }
 0x95e   : > { %v2568_v32 = vmin.f32 %v2552_v28, 0.0  ;;  %v4744_v33 = vpop.eup %3855  ;;  %3869 = vpow2.f32 %v2593_v41  ;;  %v2535_v31 = vpop.xlane.xlu0 %2534 }
 0x95f   : > { %v2538_v54 = vpop.xlane.xlu1 %2537  ;;  %v4746_v48 = vpop.eup %3857  ;;  %v2595_v56 = vmul.f32 1.442695, %v2567_v58  ;;  %v2553_v35 = vsub.f32 %v4555_v45, %v2535_v31  ;;  %2625 = vperm.xlu1 %3761, %v4744_v33  }
 0x960   : > { %v2597_v59 = vmul.f32 1.442695, %v2568_v32  ;;  %v2554_v63 = vsub.f32 %v4549_v21, %v2538_v54  ;;  %2630 = vperm.xlu0 %3762, %v4746_v48  }
 0x961   : > { %3871 = vpow2.f32 %v2595_v56  ;;  %v2569_v39 = vmin.f32 %v2553_v35, 0.0 }
 0x962   : > { %v2570_v1 = vmin.f32 %v2554_v63, 0.0  ;;  %v4752_v4 = vpop.eup %3859  ;;  %3873 = vpow2.f32 %v2597_v59 }
 0x963   : > { %v4754_v5 = vpop.eup %3861  ;;  %v2599_v3 = vmul.f32 1.442695, %v2569_v39  ;;  %2635 = vperm.xlu1 %3761, %v4752_v4  }
 0x964   : > { %v2601_v51 = vmul.f32 1.442695, %v2570_v1  ;;  %2640 = vperm.xlu0 %3762, %v4754_v5  }
 0x965   : > { %3875 = vpow2.f32 %v2599_v3 }
 0x966   : > { %v4758_v50 = vpop.eup %3863  ;;  %3877 = vpow2.f32 %v2601_v51 }
 0x967   : > { %v4760_v14 = vpop.eup %3865  ;;  %2645 = vperm.xlu1 %3761, %v4758_v50  }
 0x968   : > { %2650 = vperm.xlu0 %3762, %v4760_v14  }
 0x96a   : > { %v4764_v40 = vpop.eup %3867 }
 0x96b   : > { %v4766_v13 = vpop.eup %3869  ;;  %2655 = vperm.xlu1 %3761, %v4764_v40  }
 0x96c   : > { %2660 = vperm.xlu0 %3762, %v4766_v13  }
 0x96e   : > { %v4770_v16 = vpop.eup %3871 }
 0x96f   : > { %v4772_v24 = vpop.eup %3873  ;;  %2665 = vperm.xlu1 %3761, %v4770_v16  }
 0x970   : > { %2670 = vperm.xlu0 %3762, %v4772_v24  }
 0x972   : > { %v4776_v8 = vpop.eup %3875 }
 0x973   : > { %v4778_v30 = vpop.eup %3877  ;;  %2675 = vperm.xlu1 %3761, %v4776_v8  }
 0x974   : > { %2680 = vperm.xlu0 %3762, %v4778_v30  }
 0x9d2   : > { %v2611_v41 = vpop.permute.xlu1 %2610 }
 0x9d3   : > { %v2606_v26 = vpop.permute.xlu0 %2605  ;;  %v2684_v28 = vmul.f32 %v2611_v41, %v4586_v42 }
 0x9d4   : > { %v2683_v58 = vmul.f32 %v2606_v26, %v4571_v52 }
 0x9d5   : > { %v2700_v32 = vsel %vm2437_vm8, %v2684_v28, 0.0 }
 0x9d6   : > { %v2699_v31 = vsel %vm2437_vm8, %v2683_v58, 0.0  ;;  %v2616_v54 = vpop.permute.xlu1 %2615 }
 0x9d7   : > { %v2621_v56 = vpop.permute.xlu0 %2620  ;;  %v2685_v59 = vmul.f32 %v2616_v54, %v4566_v37  ;;  %v2701_v35 = vadd.f32 %v2700_v32, %v2699_v31 }
 0x9d8   : > { %v2686_v63 = vmul.f32 %v2621_v56, %v4581_v34 }
 0x9d9   : > { %v2702_v39 = vsel %vm2437_vm8, %v2685_v59, 0.0 }
 0x9da   : > { %v2703_v1 = vadd.f32 %v2702_v39, %v2701_v35  ;;  %v2626_v3 = vpop.permute.xlu1 %2625  ;;  %v2704_v51 = vsel %vm2437_vm8, %v2686_v63, 0.0 }
 0x9db   : > { %v2631_v41 = vpop.permute.xlu0 %2630  ;;  %v2687_v26 = vmul.f32 %v2626_v3, %v4561_v36 }
 0x9dc   : > { %v2688_v28 = vmul.f32 %v2631_v41, %v4591_v43  ;;  %v2705_v47 = vadd.f32 %v2704_v51, %v2703_v1 }
 0x9dd   : > { %v2706_v58 = vsel %vm2437_vm8, %v2687_v26, 0.0 }
 0x9de   : > { %v2707_v12 = vadd.f32 %v2706_v58, %v2705_v47  ;;  %v2636_v9 = vpop.permute.xlu1 %2635  ;;  %v2708_v32 = vsel %vm2437_vm8, %v2688_v28, 0.0 }
 0x9df   : > { %v2641_v31 = vpop.permute.xlu0 %2640  ;;  %v2689_v54 = vmul.f32 %v2636_v9, %v4596_v44 }
 0x9e0   : > { %v2690_v56 = vmul.f32 %v2641_v31, %v4576_v0  ;;  %v2709_v59 = vadd.f32 %v2708_v32, %v2707_v12 }
 0x9e1   : > { %v2710_v35 = vsel %vm2437_vm8, %v2689_v54, 0.0 }
 0x9e2   : > { %v2711_v63 = vadd.f32 %v2710_v35, %v2709_v59  ;;  %v2646_v39 = vpop.permute.xlu1 %2645  ;;  %v2712_v3 = vsel %vm2437_vm8, %v2690_v56, 0.0 }
 0x9e3   : > { %v2651_v41 = vpop.permute.xlu0 %2650  ;;  %v2691_v1 = vmul.f32 %v2646_v39, %v4619_v53 }
 0x9e4   : > { %v2692_v47 = vmul.f32 %v2651_v41, %v4607_v49  ;;  %v2713_v51 = vadd.f32 %v2712_v3, %v2711_v63 }
 0x9e5   : > { %v2714_v26 = vsel %vm2437_vm8, %v2691_v1, 0.0 }
 0x9e6   : > { %v2715_v28 = vadd.f32 %v2714_v26, %v2713_v51  ;;  %v2656_v58 = vpop.permute.xlu1 %2655  ;;  %v2716_v9 = vsel %vm2437_vm8, %v2692_v47, 0.0 }
 0x9e7   : > { %v2661_v31 = vpop.permute.xlu0 %2660  ;;  %v2693_v12 = vmul.f32 %v2656_v58, %v4614_v38 }
 0x9e8   : > { %v2694_v32 = vmul.f32 %v2661_v31, %v4602_v46  ;;  %v2717_v54 = vadd.f32 %v2716_v9, %v2715_v28 }
 0x9e9   : > { %v2718_v56 = vsel %vm2437_vm8, %v2693_v12, 0.0 }
 0x9ea   : > { %v2719_v59 = vadd.f32 %v2718_v56, %v2717_v54  ;;  %v2666_v35 = vpop.permute.xlu1 %2665  ;;  %v2720_v39 = vsel %vm2437_vm8, %v2694_v32, 0.0 }
 0x9eb   : > { %v2671_v41 = vpop.permute.xlu0 %2670  ;;  %v2695_v63 = vmul.f32 %v2666_v35, %v4643_v62 }
 0x9ec   : > { %v2696_v3 = vmul.f32 %v2671_v41, %v4631_v57  ;;  %v2721_v1 = vadd.f32 %v2720_v39, %v2719_v59 }
 0x9ed   : > { %v2722_v47 = vsel %vm2437_vm8, %v2695_v63, 0.0 }
 0x9ee   : > { %v2723_v51 = vadd.f32 %v2722_v47, %v2721_v1  ;;  %v2676_v26 = vpop.permute.xlu1 %2675  ;;  %v2724_v58 = vsel %vm2437_vm8, %v2696_v3, 0.0 }
 0x9ef   : > { %v2681_v31 = vpop.permute.xlu0 %2680  ;;  %v2697_v28 = vmul.f32 %v2676_v26, %v4664_v61 }
 0x9f0   : > { %v2698_v9 = vmul.f32 %v2681_v31, %v4638_v60  ;;  %v2725_v12 = vadd.f32 %v2724_v58, %v2723_v51 }
 0x9f1   : > { %v2726_v32 = vsel %vm2437_vm8, %v2697_v28, 0.0 }
 0x9f2   : > { %v2727_v54 = vadd.f32 %v2726_v32, %v2725_v12  ;;  %v2728_v56 = vsel %vm2437_vm8, %v2698_v9, 0.0 }
 0x9f4   : > { %v2729_v35 = vadd.f32 %v2728_v56, %v2727_v54 }
 0x9f6   : > { %v2730_v41 = vrot.slane %v2729_v35, 4 }
 0x9f8   : > { %v2731_v59 = vadd.f32 %v2730_v41, %v2729_v35 }
 0x9fa   : > { %v2732_v39 = vrot.slane %v2731_v59, 2 }
 0x9fc   : > { %v2733_v63 = vadd.f32 %v2732_v39, %v2731_v59 }
 0x9fe   : > { %v2734_v1 = vrot.slane %v2733_v63, 1 }
 0xa00   : > { %v2735_v47 = vadd.f32 %v2734_v1, %v2733_v63 }
 0xa02   : > { %3879 = vrcp.f32 %v2735_v47 }
 0xa0f   : > { %v3880_v3 = vpop.eup %3879 }
 0xa10   : > { %v2752_v11 = vmul.f32 %v3880_v3, %v4638_v60  ;;  %v2751_v26 = vmul.f32 %v3880_v3, %v4664_v61  ;;  %v2750_v31 = vmul.f32 %v3880_v3, %v4631_v57  ;;  %v2749_v28 = vmul.f32 %v3880_v3, %v4643_v62 }
 0xa11   : > { %v2748_v32 = vmul.f32 %v3880_v3, %v4602_v46  ;;  %v2747_v60 = vmul.f32 %v3880_v3, %v4614_v38  ;;  %v2746_v57 = vmul.f32 %v3880_v3, %v4607_v49  ;;  %v2745_v62 = vmul.f32 %v3880_v3, %v4619_v53 }
 0xa12   : > { %v2798_v51 = vsel %vm2437_vm8, %v2752_v11, 0.0  ;;  %v2795_v58 = vsel %vm2437_vm8, %v2751_v26, 0.0  ;;  %v2792_v9 = vsel %vm2437_vm8, %v2750_v31, 0.0  ;;  %v2789_v12 = vsel %vm2437_vm8, %v2749_v28, 0.0 }
 0xa13   : > { %2799 = vadd.xlane.f32.xlu0 %v2798_v51  ;;  %2796 = vadd.xlane.f32.xlu1 %v2795_v58  ;;  %v2786_v11 = vsel %vm2437_vm8, %v2748_v32, 0.0  ;;  %v2783_v61 = vsel %vm2437_vm8, %v2747_v60, 0.0  ;;  %v2780_v54 = vsel %vm2437_vm8, %v2746_v57, 0.0  ;;  %v2777_v56 = vsel %vm2437_vm8, %v2745_v62, 0.0 }
 0xa14   : > { %v2744_v46 = vmul.f32 %v3880_v3, %v4576_v0  ;;  %v2743_v38 = vmul.f32 %v3880_v3, %v4596_v44  ;;  %v2742_v49 = vmul.f32 %v3880_v3, %v4591_v43  ;;  %v2741_v53 = vmul.f32 %v3880_v3, %v4561_v36 }
 0xa15   : > { %v2740_v0 = vmul.f32 %v3880_v3, %v4581_v34  ;;  %v2739_v44 = vmul.f32 %v3880_v3, %v4566_v37  ;;  %v2738_v43 = vmul.f32 %v3880_v3, %v4586_v42  ;;  %v2737_v36 = vmul.f32 %v3880_v3, %v4571_v52 }
 0xa16   : > { %v2774_v35 = vsel %vm2437_vm8, %v2744_v46, 0.0  ;;  %v2771_v41 = vsel %vm2437_vm8, %v2743_v38, 0.0  ;;  %v2768_v59 = vsel %vm2437_vm8, %v2742_v49, 0.0  ;;  %v2765_v39 = vsel %vm2437_vm8, %v2741_v53, 0.0 }
 0xa17   : > { %2793 = vadd.xlane.f32.xlu1 %v2792_v9  ;;  %2790 = vadd.xlane.f32.xlu0 %v2789_v12  ;;  %v2762_v63 = vsel %vm2437_vm8, %v2740_v0, 0.0  ;;  %v2759_v1 = vsel %vm2437_vm8, %v2739_v44, 0.0  ;;  %v2756_v47 = vsel %vm2437_vm8, %v2738_v43, 0.0  ;;  %v2753_v26 = vsel %vm2437_vm8, %v2737_v36, 0.0 }
 0xa18   : > { %vm3947_vm8 = vmmov 0  }
 0xa1b   : > { %2787 = vadd.xlane.f32.xlu1 %v2786_v11  ;;  %2784 = vadd.xlane.f32.xlu0 %v2783_v61 }
 0xa1f   : > { %2781 = vadd.xlane.f32.xlu1 %v2780_v54  ;;  %2778 = vadd.xlane.f32.xlu0 %v2777_v56 }
 0xa23   : > { %2775 = vadd.xlane.f32.xlu1 %v2774_v35  ;;  %2772 = vadd.xlane.f32.xlu0 %v2771_v41 }
 0xa27   : > { %2769 = vadd.xlane.f32.xlu1 %v2768_v59  ;;  %2766 = vadd.xlane.f32.xlu0 %v2765_v39 }
 0xa2b   : > { %2763 = vadd.xlane.f32.xlu1 %v2762_v63  ;;  %2760 = vadd.xlane.f32.xlu0 %v2759_v1 }
 0xa2f   : > { %2757 = vadd.xlane.f32.xlu1 %v2756_v47  ;;  %2754 = vadd.xlane.f32.xlu0 %v2753_v26 }
 0xa9c   : > { %v2800_v34 = vpop.xlane.xlu0 %2799  ;;  %v2797_v37 = vpop.xlane.xlu1 %2796 }
 0xa9d   : > { %v2816_v51 = vmul.f32 %v4778_v30, %v2800_v34  ;;  %v2815_v58 = vmul.f32 %v4776_v8, %v2797_v37 }
 0xa9f   : > { %2895 = vperm.xlu1 %3761, %v2816_v51   ;;  %2890 = vperm.xlu0 %3762, %v2815_v58  }
 0xaa0   : > { %v2794_v31 = vpop.xlane.xlu1 %2793  ;;  %v2791_v42 = vpop.xlane.xlu0 %2790 }
 0xaa1   : > { %v2814_v52 = vmul.f32 %v4772_v24, %v2794_v31  ;;  %v2813_v3 = vmul.f32 %v4770_v16, %v2791_v42 }
 0xaa3   : > { %2880 = vperm.xlu1 %3761, %v2813_v3   ;;  %2885 = vperm.xlu0 %3762, %v2814_v52   ;;  %v4975_v52 = vld [vmem:[#allocation9_spill] sm:$0xff] }
 0xaa4   : > { %v2788_v28 = vpop.xlane.xlu1 %2787  ;;  %v2785_v9 = vpop.xlane.xlu0 %2784 }
 0xaa5   : > { %v2812_v12 = vmul.f32 %v4766_v13, %v2788_v28  ;;  %v2811_v32 = vmul.f32 %v4764_v40, %v2785_v9 }
 0xaa7   : > { %2870 = vperm.xlu1 %3761, %v2811_v32   ;;  %2875 = vperm.xlu0 %3762, %v2812_v12  }
 0xaa8   : > { %v2782_v30 = vpop.xlane.xlu1 %2781  ;;  %v2779_v8 = vpop.xlane.xlu0 %2778 }
 0xaa9   : > { %v2810_v60 = vmul.f32 %v4760_v14, %v2782_v30  ;;  %v2809_v11 = vmul.f32 %v4758_v50, %v2779_v8 }
 0xaab   : > { %2860 = vperm.xlu1 %3761, %v2809_v11   ;;  %2865 = vperm.xlu0 %3762, %v2810_v60  }
 0xaac   : > { %v2776_v24 = vpop.xlane.xlu1 %2775  ;;  %v2773_v16 = vpop.xlane.xlu0 %2772 }
 0xaad   : > { %v2808_v61 = vmul.f32 %v4754_v5, %v2776_v24  ;;  %v2807_v57 = vmul.f32 %v4752_v4, %v2773_v16 }
 0xaaf   : > { %2850 = vperm.xlu1 %3761, %v2807_v57   ;;  %2855 = vperm.xlu0 %3762, %v2808_v61  }
 0xab0   : > { %v2770_v13 = vpop.xlane.xlu1 %2769  ;;  %v2767_v40 = vpop.xlane.xlu0 %2766 }
 0xab1   : > { %v2806_v62 = vmul.f32 %v4746_v48, %v2770_v13  ;;  %v2805_v54 = vmul.f32 %v4744_v33, %v2767_v40  ;;  %v4974_v33 = vmov 0.0  }
 0xab2   : > { %3680 = vmatprep.mubr.msk.bf16.mxu1 %vm3947_vm8, %v4974_v33 }
 0xab3   : > { %2840 = vperm.xlu1 %3761, %v2805_v54   ;;  %2845 = vperm.xlu0 %3762, %v2806_v62  }
 0xab4   : > { %v2764_v14 = vpop.xlane.xlu1 %2763  ;;  %v2761_v50 = vpop.xlane.xlu0 %2760 }
 0xab5   : > { %v2804_v56 = vmul.f32 %v4738_v19, %v2764_v14  ;;  %v2803_v46 = vmul.f32 %v4736_v20, %v2761_v50 }
 0xab7   : > { %2830 = vperm.xlu1 %3761, %v2803_v46   ;;  %2835 = vperm.xlu0 %3762, %v2804_v56  }
 0xab8   : > { %v2758_v5 = vpop.xlane.xlu1 %2757  ;;  %v2755_v4 = vpop.xlane.xlu0 %2754 }
 0xab9   : > { %v2802_v38 = vmul.f32 %v4728_v7, %v2758_v5  ;;  %v2801_v35 = vmul.f32 %v4730_v10, %v2755_v4 }
 0xabb   : > { %2825 = vperm.xlu0 %3762, %v2802_v38   ;;  %2820 = vperm.xlu1 %3761, %v2801_v35  }
 0xb1a   : > { %v2896_v48 = vpop.permute.xlu1 %2895  ;;  %v2891_v41 = vpop.permute.xlu0 %2890 }
 0xb1b   : > { %v2913_v49 = vmul.f32 %v2896_v48, %v4549_v21  ;;  %v2912_v19 = vmul.f32 %v2891_v41, %v4555_v45 }
 0xb1d   : > { %v2921_v20 = vpack.c.bf16 %v2913_v49, %v2912_v19 }
 0xb1e   : > { %v2881_v53 = vpop.permute.xlu1 %2880  ;;  %v2886_v59 = vpop.permute.xlu0 %2885 }
 0xb1f   : > { %v2910_v39 = vmul.f32 %v2881_v53, %v4551_v55  ;;  %v2911_v7 = vmul.f32 %v2886_v59, %v4543_v18  ;;  %3665 = vmatpush3.bf16.msra.mxu1 %v2921_v20 }
 0xb20   : > { %3666 = vmatprep.subr.bf16.mxu1 %v4974_v33 }
 0xb21   : > { %v2920_v10 = vpack.c.bf16 %v2911_v7, %v2910_v39 }
 0xb22   : > { %v2871_v0 = vpop.permute.xlu1 %2870  ;;  %v2876_v44 = vpop.permute.xlu0 %2875 }
 0xb23   : > { %v2908_v63 = vmul.f32 %v2871_v0, %v4540_v29  ;;  %v2909_v1 = vmul.f32 %v2876_v44, %v4530_v25  ;;  %3667 = vmatpush3.bf16.msra.mxu1 %v2920_v10 }
 0xb24   : > { %3668 = vmatprep.subr.bf16.mxu1 %v4974_v33 }
 0xb25   : > { %v2919_v21 = vpack.c.bf16 %v2909_v1, %v2908_v63 }
 0xb26   : > { %v2861_v45 = vpop.permute.xlu1 %2860  ;;  %v2866_v43 = vpop.permute.xlu0 %2865 }
 0xb27   : > { %v2906_v55 = vmul.f32 %v2861_v45, %v4545_v27  ;;  %v2907_v18 = vmul.f32 %v2866_v43, %v4536_v22  ;;  %3669 = vmatpush3.bf16.msra.mxu1 %v2919_v21 }
 0xb28   : > { %3670 = vmatprep.subr.bf16.mxu1 %v4974_v33 }
 0xb29   : > { %v2918_v36 = vpack.c.bf16 %v2907_v18, %v2906_v55 }
 0xb2a   : > { %v2851_v47 = vpop.permute.xlu1 %2850  ;;  %v2856_v26 = vpop.permute.xlu0 %2855 }
 0xb2b   : > { %v2904_v29 = vmul.f32 %v2851_v47, %v4522_v15  ;;  %v2905_v25 = vmul.f32 %v2856_v26, %v4528_v23  ;;  %3671 = vmatpush3.bf16.msra.mxu1 %v2918_v36 }
 0xb2c   : > { %3672 = vmatprep.subr.bf16.mxu1 %v4974_v33 }
 0xb2d   : > { %v2917_v34 = vpack.c.bf16 %v2905_v25, %v2904_v29 }
 0xb2e   : > { %v2841_v37 = vpop.permute.xlu1 %2840  ;;  %v2846_v51 = vpop.permute.xlu0 %2845 }
 0xb2f   : > { %v2902_v27 = vmul.f32 %v2841_v37, %v4525_v2  ;;  %v2903_v22 = vmul.f32 %v2846_v51, %v4534_v17  ;;  %3673 = vmatpush3.bf16.msra.mxu1 %v2917_v34  ;;  %v4976_v2 = vld [vmem:[#allocation8_spill] sm:$0xff]  ;;  %v4977_v17 = vld [vmem:[#allocation10_spill] sm:$0xff] }
 0xb30   : > { %3674 = vmatprep.subr.bf16.mxu1 %v4974_v33 }
 0xb31   : > { %v2916_v58 = vpack.c.bf16 %v2903_v22, %v2902_v27 }
 0xb32   : > { %v2831_v31 = vpop.permute.xlu1 %2830  ;;  %v2836_v42 = vpop.permute.xlu0 %2835 }
 0xb33   : > { %v2900_v15 = vmul.f32 %v2831_v31, %v4510_v6  ;;  %v2901_v23 = vmul.f32 %v2836_v42, %v4975_v52  ;;  %3675 = vmatpush3.bf16.msra.mxu1 %v2916_v58  ;;  %v2817_v6 = vld [vmem:[%s4952_s2] sm:$0x1] }
 0xb34   : > { %3676 = vmatprep.subr.bf16.mxu1 %v4974_v33 }
 0xb35   : > { %v2915_v3 = vpack.c.bf16 %v2901_v23, %v2900_v15 }
 0xb36   : > { %v2821_v28 = vpop.permute.xlu1 %2820  ;;  %v2826_v9 = vpop.permute.xlu0 %2825 }
 0xb37   : > { %v2898_v12 = vmul.f32 %v2821_v28, %v4976_v2  ;;  %v2899_v32 = vmul.f32 %v2826_v9, %v4977_v17  ;;  %3677 = vmatpush3.bf16.msra.mxu1 %v2915_v3 }
 0xb38   : > { %3678 = vmatprep.subr.bf16.mxu1 %v4974_v33 }
 0xb39   : > { %v2914_v30 = vpack.c.bf16 %v2899_v32, %v2898_v12 }
 0xb3b   : > { %3679 = vmatpush3.bf16.msra.mxu1 %v2914_v30 }
 0xb3e   : > { %3681 = vmatmul.mubr.bf16.vlgmr.msra.gmra.mxu1 %v2817_v6 }
 0xbfe   : > { %v2956_v8 = vpop.f32.mrf.mxu1 }
 0xbff   : > { %2964 = vst.msk [vmem:[%s2962_s28] sm:$0x3] %vm2963_vm9, %v2956_v8 }
 0xc00   : > { %v3682_v60 = vpop.f32.mrf.mxu1  ;;  %2968 = sbr.rel (%p3339_p5) target bundleno = 3607 (0xe17), region = 96 }
 0xc02   : > { %v2959_v11 = vpop.f32.mrf.mxu1 }
 0xc04   : > { %v3683_v24 = vpop.f32.mrf.mxu1 }
 0xc05   : > { %v3881_v16 = vld [vmem:[%s4960_s10 + $0x38] sm:$0xff]   ;;  %v3948_v61 = vmov 0.0   ;;  %v3883_v13 = vld [vmem:[%s4960_s10 + $0x30] sm:$0xff]   ;;  %vm3949_vm10 = vmmov 0   ;;  %v3885_v62 = vld [vmem:[%s4960_s10 + $0x28] sm:$0xff]   ;;  %v2987_v46 = vpack.c.bf16 %v2956_v8, %v2956_v8  ;;  %vm3130_vm11 = vcmask 25600  }
 0xc06   : > { %3684 = vmatprep.subr.bf16.mxu0 %v3948_v61  ;;  %3696 = vmatprep.subr.bf16.mxu1 %v3948_v61  ;;  %v3882_v57 = vld [vmem:[%s4960_s10 + $0x18] sm:$0xff]   ;;  %v3884_v40 = vld [vmem:[%s4960_s10 + $0x10] sm:$0xff]   ;;  %v3886_v54 = vld [vmem:[%s4960_s10 + $0x8] sm:$0xff]  }
 0xc07   : > { %3685 = vmatpush3.bf16.msra.mxu0 %v3881_v16  ;;  %3692 = vmatprep.mubr.msk.bf16.mxu0 %vm3949_vm10, %v3948_v61  ;;  %v3887_v14 = vld [vmem:[%s4960_s10 + $0x20] sm:$0xff]  }
 0xc08   : > { %3697 = vmatpush3.bf16.msra.mxu1 %v3882_v57  ;;  %3686 = vmatprep.subr.bf16.mxu0 %v3948_v61  ;;  %v3888_v50 = vld [vmem:[%s4960_s10] sm:$0xff]  }
 0xc09   : > { %3698 = vmatprep.subr.bf16.mxu1 %v3948_v61  ;;  %3704 = vmatprep.mubr.msk.bf16.mxu1 %vm3949_vm10, %v3948_v61  ;;  %v2969_v56 = vld [vmem:[#allocation4] sm:$0x3] }
 0xc0a   : > { %v2986_v5 = vpack.c.bf16 %v2969_v56, %v2969_v56  ;;  %v3350_v35 = vld [vmem:[%s4964_s14] ss:$0 sm:$0xff] }
 0xc0b   : > { %3687 = vmatpush3.bf16.msra.mxu0 %v3883_v13 }
 0xc0c   : > { %3699 = vmatpush3.bf16.msra.mxu1 %v3884_v40  ;;  %3688 = vmatprep.subr.bf16.mxu0 %v3948_v61 }
 0xc0d   : > { %3700 = vmatprep.subr.bf16.mxu1 %v3948_v61 }
 0xc0f   : > { %3689 = vmatpush3.bf16.msra.mxu0 %v3885_v62 }
 0xc10   : > { %3701 = vmatpush3.bf16.msra.mxu1 %v3886_v54  ;;  %3690 = vmatprep.subr.bf16.mxu0 %v3948_v61 }
 0xc11   : > { %3702 = vmatprep.subr.bf16.mxu1 %v3948_v61 }
 0xc13   : > { %3691 = vmatpush3.bf16.msra.mxu0 %v3887_v14 }
 0xc14   : > { %3703 = vmatpush3.bf16.msra.mxu1 %v3888_v50 }
 0xc16   : > { %3693 = vmatmul.mubr.msk.bf16.vlgmr.msra.gmra.mxu0 %vm2203_vm5, %v2987_v46 }
 0xc17   : > { %3705 = vmatmul.mubr.msk.bf16.vlgmr.msra.gmra.mxu1 %vm2203_vm5, %v2986_v5 }
 0xcd6   : > { %v3049_v4 = vpop.f32.mrf.mxu0 }
 0xcd7   : > { %v3116_v38 = vpop.f32.mrf.mxu1 }
 0xcd8   : > { %v3117_v33 = vadd.f32 %v3116_v38, %v3049_v4  ;;  %v3694_v48 = vpop.f32.mrf.mxu0 }
 0xcd9   : > { %v3706_v41 = vpop.f32.mrf.mxu1 }
 0xcda   : > { %v3052_v49 = vpop.f32.mrf.mxu0  ;;  %v3129_v19 = vadd.f32 %v3350_v35, %v3117_v33 }
 0xcdb   : > { %v3119_v20 = vpop.f32.mrf.mxu1 }
 0xcdc   : > { %v3695_v53 = vpop.f32.mrf.mxu0  ;;  %v3131_v59 = vsel %vm3130_vm11, %v3129_v19, -inf }
 0xcdd   : > { %3132 = vmax.xlane.f32.xlu0 %v3131_v59  ;;  %v3707_v39 = vpop.f32.mrf.mxu1 }
 0xd66   : > { %v3133_v7 = vpop.xlane.xlu0 %3132 }
 0xd67   : > { %v3134_v10 = vsub.f32 %v3129_v19, %v3133_v7 }
 0xd69   : > { %v3135_v0 = vmul.f32 1.442695, %v3134_v10 }
 0xd6b   : > { %3889 = vpow2.f32 %v3135_v0 }
 0xd78   : > { %v3890_v44 = vpop.eup %3889 }
 0xd79   : > { %v3137_v63 = vsel %vm3130_vm11, %v3890_v44, 0.0 }
 0xd7a   : > { %3138 = vadd.xlane.f32.xlu0 %v3137_v63 }
 0xe03   : > { %v3139_v1 = vpop.xlane.xlu0 %3138 }
 0xe04   : > { %3891 = vlog2.f32 %v3139_v1 }
 0xe11   : > { %v3892_v21 = vpop.eup %3891 }
 0xe12   : > { %v3141_v45 = vmul.f32 0.6931472, %v3892_v21 }
 0xe14   : > { %v3142_v43 = vsub.f32 %v3134_v10, %v3141_v45 }
 0xe16   : > { %3143 = vst.msk [vmem:[#allocation5] sm:$0x3] %vm3130_vm11, %v3142_v43 }
 0xe17 PF: > { %p4926_p6 = scmp.eq.s32.totalorder %s3224_s21, 1  ;;  %s3950_s27 = smov [#allocation5]  }
 0xe18   : > { %s3151_s25 = sshll.u32 %s3950_s27, 4  ;;  %s3152_s25 = int_to_ptr.vmem [resolvable:$true] %s3151_s25 }
 0xe19   : > { %s3893_s28 = scalar_lea.vmem %s3152_s25, 32  ;;  %p3900_p10 = scmp.lt.s32.totalorder %s3152_s25, %s3152_s25 }
 0xe1a   : > { %p3894_p7 = scmp.ne.s32.totalorder %s3152_s25, %s3893_s28  ;;  %p3901_p11 = scmp.lt.s32.totalorder %s3893_s28, %s3893_s28 }
 0xe1c   : > { %p3895_p8 = pnand %p3894_p7, %p4926_p6  ;;  %p3902_p12 = por %p3901_p11, %p3900_p10 }
 0xe1e   : > { %p3896_p9 = pneg %p3895_p8 }
 0xe20   : > { %p3903_p13 = pnand %p3902_p12, %p3896_p9 }
 0xe22   : > { %3906 = shalt.err (!%p3903_p13)
}
 0xe23   : > { %3717 = dma.vmem_to_hbm [thread:$0]  (%p4926_p6), %s3152_s25, 32, %s4965_s15, [#allocation6]  }
 0xe24   : > { %3930 = dma.done.wait (%p4926_p6), [#allocation6], 32  }
 0xe25   : > { %3932 = vsyncadd (%p4926_p6), [#allocation6], 4294967264 }
 0xe26 PF: > { %s26_s20 = sadd.s32 1, %s3943_s20   ;;  %s4979_s18 = smov %s3939_s19 }
 0xe27   : > { %p23_p0 = scmp.ge.s32.totalorder %s26_s20, 4   ;;  %s4980_s19 = smov %s4982_s22 }
 0xe29   :  { %25 = sbr.rel (!%p23_p0) target bundleno = 2 (0x2), region = 134 }
 0xe2e   :  { %3164 = vsyncpa [#allocation6], 1 }
 0xe2f   :  { %3166 = vsyncpa [#allocation6 + $0x1], 1 }

</bundles_post_ra>
